<compile_context>
chip_gen: v6e
topology: v6e:2x2x1
jax: 0.10.0
libtpu: 0.0.40
codegen_flags: <defaults>
</compile_context>

<pallas_src>
import functools

import jax
import jax.numpy as jnp
from jax.experimental import pallas as pl
from jax.experimental.pallas import tpu as pltpu


def _round_up(x: int, m: int) -> int:
    return ((x + m - 1) // m) * m


def _cdiv(a: int, b: int) -> int:
    return (a + b - 1) // b


def _tpu_vmem_bytes() -> int:
    try:
        info = pltpu.get_tpu_info()
        v = getattr(info, "vmem_capacity_bytes", None)
        if isinstance(v, int) and v > 0:
            return v
    except Exception:
        pass
    return 64 << 20  # conservative fallback (v7x per-core VMEM)


def _tpu_cores_per_chip() -> int:
    # Defensive: only trust attributes that unambiguously mean TCs-per-chip.
    try:
        info = pltpu.get_tpu_info()
        for name in ("num_tensorcores", "tensorcores_per_chip",
                     "cores_per_chip", "num_cores_per_chip"):
            v = getattr(info, name, None)
            if isinstance(v, int) and v > 0:
                return v
    except Exception:
        pass
    return 1


# --------------------------------------------------------------------------
# Kernels
# --------------------------------------------------------------------------
def _head_kernel(x_ref, w1_ref, b1_ref, w2_ref, b2_ref, o_ref, *,
                 epilogue_dtype):
    # x_ref:  (bm, input_dim)  native dtype   w1_ref: (input_dim, inner_dim)
    # b1_ref: (1, inner_dim) f32              w2_ref: (inner_dim, n_pad)
    # b2_ref: (1, n_pad) f32                  o_ref:  (bm, n_pad)
    h = jnp.dot(x_ref[...].astype(w1_ref.dtype), w1_ref[...],
                preferred_element_type=jnp.float32)
    h = jnp.tanh((h + b1_ref[...]).astype(epilogue_dtype))
    out = jnp.dot(h.astype(w2_ref.dtype), w2_ref[...],
                  preferred_element_type=jnp.float32)
    o_ref[...] = (out + b2_ref[...]).astype(o_ref.dtype)


def _head_kernel_ksplit(x_ref, w1_ref, b1_ref, w2_ref, b2_ref, o_ref, h_acc,
                        *, epilogue_dtype):
    # Grid = (batch tiles, K tiles); K (input_dim) is the reduction axis (last).
    k = pl.program_id(1)

    @pl.when(k == 0)
    def _():
        h_acc[...] = jnp.zeros_like(h_acc)

    h_acc[...] += jnp.dot(x_ref[...].astype(w1_ref.dtype), w1_ref[...],
                          preferred_element_type=jnp.float32)

    @pl.when(k == pl.num_programs(1) - 1)
    def _():
        h = jnp.tanh((h_acc[...] + b1_ref[...]).astype(epilogue_dtype))
        out = jnp.dot(h.astype(w2_ref.dtype), w2_ref[...],
                      preferred_element_type=jnp.float32)
        o_ref[...] = (out + b2_ref[...]).astype(o_ref.dtype)


# --------------------------------------------------------------------------
# One-time parameter preparation (do this at init, NOT per forward call)
# --------------------------------------------------------------------------
def prepare_rile_head_params(w1, b1, w2, b2, *, compute_dtype=jnp.bfloat16,
                             lane_multiple=128):
    """Cast weights to the MXU compute dtype and lane-pad the tiny output dim.

    w1: (input_dim, inner_dim)  (= torch linear1.weight.T)
    b1: (inner_dim,)
    w2: (inner_dim, outer_dim)  (= torch linear2.weight.T)
    b2: (outer_dim,)
    """
    inner_dim = w1.shape[1]
    outer_dim = w2.shape[1]
    n_pad = _round_up(outer_dim, lane_multiple)
    w1_c = jnp.asarray(w1, compute_dtype)
    w2_p = jnp.pad(jnp.asarray(w2, compute_dtype),
                   ((0, 0), (0, n_pad - outer_dim)))
    b1_r = jnp.asarray(b1, jnp.float32).reshape(1, inner_dim)
    b2_r = jnp.pad(jnp.asarray(b2, jnp.float32),
                   (0, n_pad - outer_dim)).reshape(1, n_pad)
    return {"w1": w1_c, "b1": b1_r, "w2": w2_p, "b2": b2_r,
            "outer_dim": outer_dim}


# --------------------------------------------------------------------------
# Forward wrapper
# --------------------------------------------------------------------------
def rile_binned_regression_head(x, params, *, block_m=512, epilogue_dtype=None,
                                out_dtype=None, return_padded=False,
                                k_split=None, k_block=None,
                                weight_buffer_count=1, vmem_limit_bytes=None):
    """Forward pass.  x: (B, input_dim); params from prepare_rile_head_params."""
    w1, b1, w2, b2 = params["w1"], params["b1"], params["w2"], params["b2"]
    outer_dim = params["outer_dim"]

    B, input_dim = x.shape
    assert w1.shape[0] == input_dim
    inner_dim = w1.shape[1]
    n_pad = w2.shape[1]

    out_dtype = x.dtype if out_dtype is None else jnp.dtype(out_dtype)
    epilogue_dtype = w1.dtype if epilogue_dtype is None else jnp.dtype(epilogue_dtype)
    c_bytes = jnp.dtype(w1.dtype).itemsize
    x_bytes = jnp.dtype(x.dtype).itemsize
    o_bytes = jnp.dtype(out_dtype).itemsize

    # Sublane multiple for the batch tile (packed dtypes need 16/32 rows).
    min_item = min(x_bytes, c_bytes, o_bytes)
    sub = {4: 8, 2: 16, 1: 32}.get(min_item, 8)

    # ---- Batch tiling: largest tile that fits; split only on multi-TC chips.
    cores = _tpu_cores_per_chip()
    bm = max(sub, min(_round_up(block_m, sub), _round_up(B, sub)))
    if cores > 1 and _cdiv(B, bm) < cores:
        per_core = _round_up(_cdiv(B, cores), sub)
        if per_core >= 128:          # only split if each core keeps a full M tile
            bm = per_core
    b_pad = _round_up(B, bm)
    if b_pad != B:
        # TODO(synk): replace with an in-kernel row-guarded store to avoid the
        # extra HBM pass over x when B is not tile-aligned.
        x = jnp.pad(x, ((0, b_pad - B), (0, 0)))
    mt = b_pad // bm

    # ---- K (input_dim) split when single-buffered w1 would dominate VMEM.
    phys_vmem = _tpu_vmem_bytes()
    w1_bytes = input_dim * inner_dim * c_bytes
    if k_split is None:
        k_split = w1_bytes > phys_vmem // 3
    tk = None
    if k_split:
        tk = k_block
        if tk is None:
            target = max(128, (phys_vmem // 8) // max(inner_dim * c_bytes, 1))
            d = 128
            while d <= input_dim:
                if input_dim % d == 0 and d <= target:
                    tk = d
                d += 128
        if tk is None or input_dim % tk != 0:
            k_split, tk = False, None
    kt = (input_dim // tk) if k_split else 1

    # ---- VMEM budget (conservative: assumes double-buffered weights).
    x_blk_k = tk if k_split else input_dim
    need = (2 * bm * x_blk_k * x_bytes                               # x tiles
            + 2 * x_blk_k * inner_dim * c_bytes                      # w1 block(s)
            + 2 * inner_dim * n_pad * c_bytes                        # w2
            + 2 * (inner_dim + n_pad) * 4                            # biases
            + 2 * bm * n_pad * o_bytes                               # out tiles
            + bm * inner_dim * (4 + jnp.dtype(epilogue_dtype).itemsize))  # h
    if vmem_limit_bytes is None:
        cap = int(phys_vmem * 0.6)
        vmem_limit_bytes = min(max(need * 3 // 2 + (4 << 20), 32 << 20), cap)
        vmem_limit_bytes = max(vmem_limit_bytes,
                               min(need + (4 << 20), int(phys_vmem * 0.9)))
        vmem_limit_bytes = int(vmem_limit_bytes)

    cost = pl.CostEstimate(
        flops=2 * b_pad * (input_dim * inner_dim + inner_dim * n_pad),
        transcendentals=b_pad * inner_dim,
        bytes_accessed=(b_pad * input_dim * x_bytes
                        + (input_dim * inner_dim + inner_dim * n_pad) * c_bytes
                        + (inner_dim + n_pad) * 4
                        + b_pad * n_pad * o_bytes),
    )

    # Batch axis: shard across TensorCores only where >1 TC actually exists.
    batch_sem = pltpu.CORE_PARALLEL if (cores > 1 and mt > 1) else pltpu.PARALLEL

    def build(wbufs):
        def inv_spec(shape):
            kwargs = {}
            if wbufs is not None:
                kwargs["pipeline_mode"] = pl.Buffered(wbufs)
            if k_split:
                return pl.BlockSpec(shape, lambda i, k: (0, 0), **kwargs)
            return pl.BlockSpec(shape, lambda i: (0, 0), **kwargs)

        if k_split:
            kernel = functools.partial(_head_kernel_ksplit,
                                       epilogue_dtype=epilogue_dtype)
            grid = (mt, kt)
            in_specs = [
                pl.BlockSpec((bm, tk), lambda i, k: (i, k)),          # x
                pl.BlockSpec((tk, inner_dim), lambda i, k: (k, 0)),   # w1 (varies)
                inv_spec((1, inner_dim)),                             # b1
                inv_spec((inner_dim, n_pad)),                         # w2
                inv_spec((1, n_pad)),                                 # b2
            ]
            out_spec = pl.BlockSpec((bm, n_pad), lambda i, k: (i, 0))
            scratch = [pltpu.VMEM((bm, inner_dim), jnp.float32)]
            sems = (batch_sem, pltpu.ARBITRARY)
        else:
            kernel = functools.partial(_head_kernel,
                                       epilogue_dtype=epilogue_dtype)
            grid = (mt,)
            in_specs = [
                pl.BlockSpec((bm, input_dim), lambda i: (i, 0)),      # x tile
                inv_spec((input_dim, inner_dim)),                     # w1
                inv_spec((1, inner_dim)),                             # b1
                inv_spec((inner_dim, n_pad)),                         # w2
                inv_spec((1, n_pad)),                                 # b2
            ]
            out_spec = pl.BlockSpec((bm, n_pad), lambda i: (i, 0))
            scratch = []
            sems = (batch_sem,)

        return pl.pallas_call(
            kernel,
            out_shape=jax.ShapeDtypeStruct((b_pad, n_pad), out_dtype),
            grid_spec=pltpu.PrefetchScalarGridSpec(
                num_scalar_prefetch=0,
                grid=grid,
                in_specs=in_specs,
                out_specs=out_spec,
                scratch_shapes=scratch),
            compiler_params=pltpu.CompilerParams(
                dimension_semantics=sems,
                vmem_limit_bytes=vmem_limit_bytes),
            cost_estimate=cost,
        )

    if weight_buffer_count is not None and weight_buffer_count != 2:
        try:
            out = build(weight_buffer_count)(x, w1, b1, w2, b2)
        except Exception:
            # Narrow retry: only the Buffered(n) request differs; a genuine
            # kernel/compile bug will re-raise from the default-buffered build.
            out = build(None)(x, w1, b1, w2, b2)
    else:
        out = build(None)(x, w1, b1, w2, b2)

    if return_padded:
        return out            # (b_pad, 128): let the consumer fuse the slice
    return out[:B, :outer_dim]


def rile_head_ref(x, w1, b1, w2, b2):
    h = jnp.tanh(x @ w1 + b1.reshape(1, -1))
    return h @ w2 + b2.reshape(1, -1)


if __name__ == "__main__":
    # Small, deterministic shapes consistent with the module.
    batch = 16
    input_dim = 32          # transformer embedding dim (small for the test)
    inner_dim = 1024        # module default
    outer_dim = 5           # 5 RILE bins

    key = jax.random.PRNGKey(0)
    kx, kw1, kb1, kw2, kb2 = jax.random.split(key, 5)

    x = jax.random.normal(kx, (batch, input_dim), dtype=jnp.float32)
    # "Linear" params stored as (in, out), i.e. torch W.T.
    w1 = jax.random.normal(kw1, (input_dim, inner_dim), dtype=jnp.float32) * 0.02
    b1 = jax.random.normal(kb1, (inner_dim,), dtype=jnp.float32) * 0.01
    w2 = jax.random.normal(kw2, (inner_dim, outer_dim), dtype=jnp.float32) * 0.02
    b2 = jax.random.normal(kb2, (outer_dim,), dtype=jnp.float32) * 0.01

    ref = rile_head_ref(x, w1, b1, w2, b2)

    # 1) f32 compute / f32 epilogue path: matches the f32 reference closely.
    p_f32 = prepare_rile_head_params(w1, b1, w2, b2, compute_dtype=jnp.float32)
    out_f32 = jax.block_until_ready(rile_binned_regression_head(x, p_f32))
    assert out_f32.shape == (batch, outer_dim)
    assert jnp.allclose(out_f32, ref, atol=1e-4, rtol=1e-4)

    # 2) Default fast path: bf16 weights (cast ONCE here), bf16 tanh epilogue,
    #    f32 accumulation; x stays f32 in HBM and is cast inside the kernel.
    p_bf16 = prepare_rile_head_params(w1, b1, w2, b2)
    out_bf16 = jax.block_until_ready(rile_binned_regression_head(x, p_bf16))
    assert out_bf16.shape == (batch, outer_dim)
    assert jnp.allclose(out_bf16, ref, atol=2e-2, rtol=2e-2)

    # 3) Ragged batch (exercises the partial-tile pad + slice path).
    out_rag = jax.block_until_ready(rile_binned_regression_head(x[:10], p_bf16))
    assert out_rag.shape == (10, outer_dim)
    assert jnp.allclose(out_rag, ref[:10], atol=2e-2, rtol=2e-2)

    # 4) K-split reduction path (auto-selected for very large input_dim;
    #    forced here at a small shape to validate the accumulator kernel).
    input_dim2 = 256
    kx2, kw12 = jax.random.split(jax.random.PRNGKey(1))
    x2 = jax.random.normal(kx2, (batch, input_dim2), dtype=jnp.float32)
    w12 = jax.random.normal(kw12, (input_dim2, inner_dim), dtype=jnp.float32) * 0.02
    ref2 = rile_head_ref(x2, w12, b1, w2, b2)
    p2 = prepare_rile_head_params(w12, b1, w2, b2)
    out_ks = jax.block_until_ready(
        rile_binned_regression_head(x2, p2, k_split=True, k_block=128))
    assert out_ks.shape == (batch, outer_dim)
    assert jnp.allclose(out_ks, ref2, atol=2e-2, rtol=2e-2)

    print("KERNEL_OK")
</pallas_src>

<mosaic_0001>
module attributes {stable_mosaic.version = 11 : i64} {
  func.func @_head_kernel(%arg0: i32, %arg1: memref<16x32xf32, #tpu.memory_space<vmem>>, %arg2: memref<32x1024xf32, #tpu.memory_space<vmem>>, %arg3: memref<1x1024xf32, #tpu.memory_space<vmem>>, %arg4: memref<1024x128xf32, #tpu.memory_space<vmem>>, %arg5: memref<1x128xf32, #tpu.memory_space<vmem>>, %arg6: memref<16x128xf32, #tpu.memory_space<vmem>>) attributes {dimension_semantics = [#tpu.dimension_semantics<parallel>], iteration_bounds = array<i64: 1>, scalar_prefetch = 0 : i64, scratch_operands = 0 : i64, tpu.core_type = #tpu.core_type<tc>, window_params = [{transform_indices = @transform_0, window_bounds = array<i64: 16, 32>}, {pipeline_mode = #tpu.pipeline_mode<synchronous>, transform_indices = @transform_1, window_bounds = array<i64: 32, 1024>}, {pipeline_mode = #tpu.pipeline_mode<synchronous>, transform_indices = @transform_2, window_bounds = array<i64: 1, 1024>}, {pipeline_mode = #tpu.pipeline_mode<synchronous>, transform_indices = @transform_3, window_bounds = array<i64: 1024, 128>}, {pipeline_mode = #tpu.pipeline_mode<synchronous>, transform_indices = @transform_4, window_bounds = array<i64: 1, 128>}, {transform_indices = @transform_5, window_bounds = array<i64: 16, 128>}]} {
    %c0 = arith.constant 0 : index
    %c0_0 = arith.constant 0 : index
    %0 = vector.load %arg1[%c0, %c0_0] : memref<16x32xf32, #tpu.memory_space<vmem>>, vector<16x32xf32>
    %c0_1 = arith.constant 0 : index
    %c0_2 = arith.constant 0 : index
    %1 = vector.load %arg2[%c0_1, %c0_2] : memref<32x1024xf32, #tpu.memory_space<vmem>>, vector<32x1024xf32>
    %cst = arith.constant dense<0.000000e+00> : vector<16x1024xf32>
    %2 = tpu.matmul %0, %1, %cst {dimension_numbers = #tpu.dot_dimension_numbers<[1], [0], [0], [1], [0, 0, 1, 1], [], []>} : vector<16x32xf32>, vector<32x1024xf32>, vector<16x1024xf32> -> vector<16x1024xf32>
    %c0_3 = arith.constant 0 : index
    %c0_4 = arith.constant 0 : index
    %3 = vector.load %arg3[%c0_3, %c0_4] : memref<1x1024xf32, #tpu.memory_space<vmem>>, vector<1x1024xf32>
    %4 = vector.broadcast %3 : vector<1x1024xf32> to vector<16x1024xf32>
    %5 = arith.addf %2, %4 : vector<16x1024xf32>
    %6 = math.tanh %5 : vector<16x1024xf32>
    %c0_5 = arith.constant 0 : index
    %c0_6 = arith.constant 0 : index
    %7 = vector.load %arg4[%c0_5, %c0_6] : memref<1024x128xf32, #tpu.memory_space<vmem>>, vector<1024x128xf32>
    %cst_7 = arith.constant dense<0.000000e+00> : vector<16x128xf32>
    %8 = tpu.matmul %6, %7, %cst_7 {dimension_numbers = #tpu.dot_dimension_numbers<[1], [0], [0], [1], [0, 0, 1, 1], [], []>} : vector<16x1024xf32>, vector<1024x128xf32>, vector<16x128xf32> -> vector<16x128xf32>
    %c0_8 = arith.constant 0 : index
    %c0_9 = arith.constant 0 : index
    %9 = vector.load %arg5[%c0_8, %c0_9] : memref<1x128xf32, #tpu.memory_space<vmem>>, vector<1x128xf32>
    %10 = vector.broadcast %9 : vector<1x128xf32> to vector<16x128xf32>
    %11 = arith.addf %8, %10 : vector<16x128xf32>
    %c0_10 = arith.constant 0 : index
    %c0_11 = arith.constant 0 : index
    %12 = vector.load %arg6[%c0_10, %c0_11] : memref<16x128xf32, #tpu.memory_space<vmem>>, vector<16x128xf32>
    tpu.vector_store %arg6[%c0_10, %c0_11], %11 {strides = array<i32>} : memref<16x128xf32, #tpu.memory_space<vmem>>, vector<16x128xf32>,
    return
  }
  func.func @transform_0(%arg0: i32) -> (i32, i32) {
    %c0_i32 = arith.constant 0 : i32
    %c0_i32_0 = arith.constant 0 : i32
    return %arg0, %c0_i32 : i32, i32
  }
  func.func @transform_1(%arg0: i32) -> (i32, i32) {
    %c0_i32 = arith.constant 0 : i32
    %c0_i32_0 = arith.constant 0 : i32
    %c0_i32_1 = arith.constant 0 : i32
    return %c0_i32, %c0_i32_0 : i32, i32
  }
  func.func @transform_2(%arg0: i32) -> (i32, i32) {
    %c0_i32 = arith.constant 0 : i32
    %c0_i32_0 = arith.constant 0 : i32
    %c0_i32_1 = arith.constant 0 : i32
    return %c0_i32, %c0_i32_0 : i32, i32
  }
  func.func @transform_3(%arg0: i32) -> (i32, i32) {
    %c0_i32 = arith.constant 0 : i32
    %c0_i32_0 = arith.constant 0 : i32
    %c0_i32_1 = arith.constant 0 : i32
    return %c0_i32, %c0_i32_0 : i32, i32
  }
  func.func @transform_4(%arg0: i32) -> (i32, i32) {
    %c0_i32 = arith.constant 0 : i32
    %c0_i32_0 = arith.constant 0 : i32
    %c0_i32_1 = arith.constant 0 : i32
    return %c0_i32, %c0_i32_0 : i32, i32
  }
  func.func @transform_5(%arg0: i32) -> (i32, i32) {
    %c0_i32 = arith.constant 0 : i32
    %c0_i32_0 = arith.constant 0 : i32
    return %arg0, %c0_i32 : i32, i32
  }
}

module attributes {stable_mosaic.version = 11 : i64} {
  func.func @_head_kernel(%arg0: i32, %arg1: memref<16x32xf32, #tpu.memory_space<vmem>>, %arg2: memref<32x1024xf32, #tpu.memory_space<vmem>>, %arg3: memref<1x1024xf32, #tpu.memory_space<vmem>>, %arg4: memref<1024x128xf32, #tpu.memory_space<vmem>>, %arg5: memref<1x128xf32, #tpu.memory_space<vmem>>, %arg6: memref<16x128xf32, #tpu.memory_space<vmem>>) attributes {dimension_semantics = [#tpu.dimension_semantics<parallel>], iteration_bounds = array<i64: 1>, scalar_prefetch = 0 : i64, scratch_operands = 0 : i64, tpu.core_type = #tpu.core_type<tc>, window_params = [{transform_indices = @transform_0, window_bounds = array<i64: 16, 32>}, {pipeline_mode = #tpu.pipeline_mode<synchronous>, transform_indices = @transform_1, window_bounds = array<i64: 32, 1024>}, {pipeline_mode = #tpu.pipeline_mode<synchronous>, transform_indices = @transform_2, window_bounds = array<i64: 1, 1024>}, {pipeline_mode = #tpu.pipeline_mode<synchronous>, transform_indices = @transform_3, window_bounds = array<i64: 1024, 128>}, {pipeline_mode = #tpu.pipeline_mode<synchronous>, transform_indices = @transform_4, window_bounds = array<i64: 1, 128>}, {transform_indices = @transform_5, window_bounds = array<i64: 16, 128>}]} {
    %c0 = arith.constant 0 : index
    %c0_0 = arith.constant 0 : index
    %0 = vector.load %arg1[%c0, %c0_0] : memref<16x32xf32, #tpu.memory_space<vmem>>, vector<16x32xf32>
    %c0_1 = arith.constant 0 : index
    %c0_2 = arith.constant 0 : index
    %1 = vector.load %arg2[%c0_1, %c0_2] : memref<32x1024xf32, #tpu.memory_space<vmem>>, vector<32x1024xf32>
    %cst = arith.constant dense<0.000000e+00> : vector<16x1024xf32>
    %2 = tpu.matmul %0, %1, %cst {dimension_numbers = #tpu.dot_dimension_numbers<[1], [0], [0], [1], [0, 0, 1, 1], [], []>} : vector<16x32xf32>, vector<32x1024xf32>, vector<16x1024xf32> -> vector<16x1024xf32>
    %c0_3 = arith.constant 0 : index
    %c0_4 = arith.constant 0 : index
    %3 = vector.load %arg3[%c0_3, %c0_4] : memref<1x1024xf32, #tpu.memory_space<vmem>>, vector<1x1024xf32>
    %4 = vector.broadcast %3 : vector<1x1024xf32> to vector<16x1024xf32>
    %5 = arith.addf %2, %4 : vector<16x1024xf32>
    %6 = math.tanh %5 : vector<16x1024xf32>
    %c0_5 = arith.constant 0 : index
    %c0_6 = arith.constant 0 : index
    %7 = vector.load %arg4[%c0_5, %c0_6] : memref<1024x128xf32, #tpu.memory_space<vmem>>, vector<1024x128xf32>
    %cst_7 = arith.constant dense<0.000000e+00> : vector<16x128xf32>
    %8 = tpu.matmul %6, %7, %cst_7 {dimension_numbers = #tpu.dot_dimension_numbers<[1], [0], [0], [1], [0, 0, 1, 1], [], []>} : vector<16x1024xf32>, vector<1024x128xf32>, vector<16x128xf32> -> vector<16x128xf32>
    %c0_8 = arith.constant 0 : index
    %c0_9 = arith.constant 0 : index
    %9 = vector.load %arg5[%c0_8, %c0_9] : memref<1x128xf32, #tpu.memory_space<vmem>>, vector<1x128xf32>
    %10 = vector.broadcast %9 : vector<1x128xf32> to vector<16x128xf32>
    %11 = arith.addf %8, %10 : vector<16x128xf32>
    %c0_10 = arith.constant 0 : index
    %c0_11 = arith.constant 0 : index
    %12 = vector.load %arg6[%c0_10, %c0_11] : memref<16x128xf32, #tpu.memory_space<vmem>>, vector<16x128xf32>
    tpu.vector_store %arg6[%c0_10, %c0_11], %11 {strides = array<i32>} : memref<16x128xf32, #tpu.memory_space<vmem>>, vector<16x128xf32>,
    return
  }
  func.func @transform_0(%arg0: i32) -> (i32, i32) {
    %c0_i32 = arith.constant 0 : i32
    %c0_i32_0 = arith.constant 0 : i32
    return %arg0, %c0_i32 : i32, i32
  }
  func.func @transform_1(%arg0: i32) -> (i32, i32) {
    %c0_i32 = arith.constant 0 : i32
    %c0_i32_0 = arith.constant 0 : i32
    %c0_i32_1 = arith.constant 0 : i32
    return %c0_i32, %c0_i32_0 : i32, i32
  }
  func.func @transform_2(%arg0: i32) -> (i32, i32) {
    %c0_i32 = arith.constant 0 : i32
    %c0_i32_0 = arith.constant 0 : i32
    %c0_i32_1 = arith.constant 0 : i32
    return %c0_i32, %c0_i32_0 : i32, i32
  }
  func.func @transform_3(%arg0: i32) -> (i32, i32) {
    %c0_i32 = arith.constant 0 : i32
    %c0_i32_0 = arith.constant 0 : i32
    %c0_i32_1 = arith.constant 0 : i32
    return %c0_i32, %c0_i32_0 : i32, i32
  }
  func.func @transform_4(%arg0: i32) -> (i32, i32) {
    %c0_i32 = arith.constant 0 : i32
    %c0_i32_0 = arith.constant 0 : i32
    %c0_i32_1 = arith.constant 0 : i32
    return %c0_i32, %c0_i32_0 : i32, i32
  }
  func.func @transform_5(%arg0: i32) -> (i32, i32) {
    %c0_i32 = arith.constant 0 : i32
    %c0_i32_0 = arith.constant 0 : i32
    return %arg0, %c0_i32 : i32, i32
  }
}

</mosaic_0001>

<bundles_post_ra>
// kernel: tpu_custom_call.1
= control target key start
LH: loop header
LB: loop body
LE: loop exit
PB: predicated region body
PF: predicated region fallthrough
CT: control target
= control target key end

     0   :  { %10 = vsyncpa [#allocation3], 0  ;;  %s1368_s0 = inlined_call_operand.hbm [shape: f32[16,32], index: 0, kind: input, shape index: {}]   ;;  %s1369_s1 = inlined_call_operand.hbm [shape: f32[32,1024], index: 1, kind: input, shape index: {}]   ;;  %s1370_s2 = inlined_call_operand.hbm [shape: f32[1,1024], index: 2, kind: input, shape index: {}]   ;;  %s1371_s3 = inlined_call_operand.hbm [shape: f32[1024,128], index: 3, kind: input, shape index: {}]   ;;  %s1372_s4 = inlined_call_operand.vmem [shape: f32[1,128], index: 4, kind: input, shape index: {}]   ;;  %s1373_s5 = inlined_call_operand.hbm [shape: f32[16,128], index: 5, kind: output, shape index: {}]  }
   0x1   :  { %11 = vsyncpa [#allocation6], 0 }
   0x2   :  { %12 = vsyncpa [#allocation9], 0 }
   0x3   :  { %13 = vsyncpa [#allocation4], 0  ;;  %s1248_s18 = smov [#allocation5]  }
   0x4   :  { %s31_s19 = sshll.u32 %s1248_s18, 4  ;;  %s32_s19 = int_to_ptr.vmem [resolvable:$true] %s31_s19 }
   0x5   :  { %s1148_s20 = scalar_lea.vmem %s32_s19, 4096  ;;  %p1153_p1 = scmp.lt.s32.totalorder %s32_s19, %s32_s19 }
   0x6   :  { %p1149_p0 = scmp.ne.s32.totalorder %s32_s19, %s1148_s20  ;;  %p1154_p2 = scmp.lt.s32.totalorder %s1148_s20, %s1148_s20 }
   0x8   :  { %p1155_p3 = por %p1154_p2, %p1153_p1 }
   0xa   :  { %p1156_p4 = pnand %p1155_p3, %p1149_p0 }
   0xc   :  { %1159 = shalt.err (!%p1156_p4)
}
   0xd   :  { %s1249_s21 = smov 1024   ;;  %s1250_s22 = smov 64  }
   0xe   :  { %37 = dma.hbm_to_vmem [thread:$0]  %s1369_s1, 4096, %s32_s19, [#allocation6], %s1249_s21, %s1249_s21, %s1250_s22  }
   0xf   :  { %s1251_s25 = smov [#allocation2]  }
  0x10   :  { %s19_s26 = sshll.u32 %s1251_s25, 4  ;;  %s20_s26 = int_to_ptr.vmem [resolvable:$true] %s19_s26 }
  0x11   :  { %s1168_s27 = scalar_lea.vmem %s20_s26, 256  ;;  %p1173_p6 = scmp.lt.s32.totalorder %s20_s26, %s20_s26 }
  0x12   :  { %p1169_p5 = scmp.ne.s32.totalorder %s20_s26, %s1168_s27  ;;  %p1174_p7 = scmp.lt.s32.totalorder %s1168_s27, %s1168_s27 }
  0x14   :  { %p1175_p8 = por %p1174_p7, %p1173_p6 }
  0x16   :  { %p1176_p9 = pnand %p1175_p8, %p1169_p5 }
  0x18   :  { %1179 = shalt.err (!%p1176_p9)
}
  0x19   :  { %s1252_s28 = smov 128   ;;  %s1253_s29 = smov 8  }
  0x1a   :  { %25 = dma.hbm_to_vmem [thread:$0]  %s1368_s0, 256, %s20_s26, [#allocation3], %s1252_s28, %s1252_s28, %s1253_s29  }
  0x1b   :  { %s1254_s1 = smov [#allocation7]   ;;  %s1255_s8 = smov [#allocation8]  }
  0x1c   :  { %s44_s7 = sshll.u32 %s1254_s1, 4  ;;  %s53_s9 = sshll.u32 %s1255_s8, 4  ;;  %s45_s7 = int_to_ptr.vmem [resolvable:$true] %s44_s7  ;;  %s54_s9 = int_to_ptr.vmem [resolvable:$true] %s53_s9 }
  0x1d   :  { %s1188_s10 = scalar_lea.vmem %s45_s7, 128  ;;  %p1193_p11 = scmp.lt.s32.totalorder %s45_s7, %s45_s7 }
  0x1e   :  { %p1189_p10 = scmp.ne.s32.totalorder %s45_s7, %s1188_s10  ;;  %p1194_p12 = scmp.lt.s32.totalorder %s1188_s10, %s1188_s10 }
  0x20   :  { %p1195_p13 = por %p1194_p12, %p1193_p11 }
  0x22   :  { %p1196_p0 = pnand %p1195_p13, %p1189_p10 }
  0x24   :  { %1199 = shalt.err (!%p1196_p0)
}
  0x25   :  { %47 = dma.hbm_to_vmem [thread:$0]  %s1370_s2, 128, %s45_s7, [#allocation6]  }
  0x26   :  { %s1208_s13 = scalar_lea.vmem %s54_s9, 16384  ;;  %p1213_p2 = scmp.lt.s32.totalorder %s54_s9, %s54_s9 }
  0x27   :  { %p1209_p1 = scmp.ne.s32.totalorder %s54_s9, %s1208_s13  ;;  %p1214_p3 = scmp.lt.s32.totalorder %s1208_s13, %s1208_s13 }
  0x29   :  { %p1215_p4 = por %p1214_p3, %p1213_p2 }
  0x2b   :  { %p1216_p5 = pnand %p1215_p4, %p1209_p1 }
  0x2d   :  { %1219 = shalt.err (!%p1216_p5)
}
  0x2e   :  { %59 = dma.hbm_to_vmem [thread:$0]  %s1371_s3, 16384, %s54_s9, [#allocation9], %s1252_s28, %s1252_s28, %s1253_s29  }
  0x2f   :  { %1240 = dma.done.wait [#allocation3], 256  }
  0x30   :  { %1241 = vsyncadd [#allocation3], 4294967040 }
  0x31   :  { %1242 = dma.done.wait [#allocation6], 4224  }
  0x32   :  { %1243 = vsyncadd [#allocation6], 4294963072 }
  0x33   :  { %1244 = dma.done.wait [#allocation9], 16384  }
  0x34   :  { %1245 = vsyncadd [#allocation9], 4294950912  ;;  %v1256_v0 = vmov 0.0   ;;  %v101_v1 = vld [vmem:[#allocation5 + $0xc8] sm:$0xff]  ;;  %v103_v2 = vld [vmem:[#allocation5 + $0xd8] sm:$0xff]  ;;  %vm150_vm0 = vcmask 261120  }
  0x35   :  { %221 = vmatprep.mubr.f32.mxu0 %v1256_v0  ;;  %298 = vmatprep.mubr.f32.mxu1 %v1256_v0  ;;  %v100_v3 = vld [vmem:[#allocation5 + $0xc0] sm:$0xff]  ;;  %v102_v4 = vld [vmem:[#allocation5 + $0xd0] sm:$0xff]  ;;  %v93_v5 = vld [vmem:[#allocation5 + $0x88] sm:$0xff] }
  0x36   :  { %181 = vmatprep.subr.mxu0 %v101_v1  ;;  %258 = vmatprep.subr.mxu1 %v103_v2  ;;  %v95_v6 = vld [vmem:[#allocation5 + $0x98] sm:$0xff]  ;;  %v92_v7 = vld [vmem:[#allocation5 + $0x80] sm:$0xff]  ;;  %v94_v8 = vld [vmem:[#allocation5 + $0x90] sm:$0xff] }
  0x37   :  { %182 = vmatpush1.msra.mxu0 %v100_v3  ;;  %259 = vmatpush1.msra.mxu1 %v102_v4  ;;  %v85_v9 = vld [vmem:[#allocation5 + $0x48] sm:$0xff]  ;;  %v87_v10 = vld [vmem:[#allocation5 + $0x58] sm:$0xff]  ;;  %v84_v11 = vld [vmem:[#allocation5 + $0x40] sm:$0xff] }
  0x38   :  { %183 = vmatprep.subr.mxu0 %v93_v5  ;;  %260 = vmatprep.subr.mxu1 %v95_v6  ;;  %v86_v12 = vld [vmem:[#allocation5 + $0x50] sm:$0xff]  ;;  %v77_v13 = vld [vmem:[#allocation5 + $0x8] sm:$0xff]  ;;  %v79_v14 = vld [vmem:[#allocation5 + $0x18] sm:$0xff] }
  0x39   :  { %184 = vmatpush1.msra.mxu0 %v92_v7  ;;  %261 = vmatpush1.msra.mxu1 %v94_v8  ;;  %v76_v15 = vld [vmem:[#allocation5] sm:$0xff]  ;;  %v78_v16 = vld [vmem:[#allocation5 + $0x10] sm:$0xff]  ;;  %v105_v18 = vld [vmem:[#allocation5 + $0xe8] sm:$0xff] }
  0x3a   :  { %185 = vmatprep.subr.mxu0 %v85_v9  ;;  %262 = vmatprep.subr.mxu1 %v87_v10  ;;  %v74_v17 = vld [vmem:[#allocation2] sm:$0xff]  ;;  %v104_v19 = vld [vmem:[#allocation5 + $0xe0] sm:$0xff]  ;;  %v97_v20 = vld [vmem:[#allocation5 + $0xa8] sm:$0xff] }
  0x3b   :  { %186 = vmatpush1.msra.mxu0 %v84_v11  ;;  %263 = vmatpush1.msra.mxu1 %v86_v12  ;;  %v107_v21 = vld [vmem:[#allocation5 + $0xf8] sm:$0xff]  ;;  %v96_v23 = vld [vmem:[#allocation5 + $0xa0] sm:$0xff]  ;;  %v106_v24 = vld [vmem:[#allocation5 + $0xf0] sm:$0xff] }
  0x3c   :  { %187 = vmatprep.subr.mxu0 %v77_v13  ;;  %264 = vmatprep.subr.mxu1 %v79_v14  ;;  %v75_v22 = vld [vmem:[#allocation2 + $0x8] sm:$0xff]  ;;  %v89_v25 = vld [vmem:[#allocation5 + $0x68] sm:$0xff]  ;;  %v88_v27 = vld [vmem:[#allocation5 + $0x60] sm:$0xff] }
  0x3d   :  { %188 = vmatpush1.msra.mxu0 %v76_v15  ;;  %265 = vmatpush1.msra.mxu1 %v78_v16  ;;  %v99_v26 = vld [vmem:[#allocation5 + $0xb8] sm:$0xff]  ;;  %v98_v28 = vld [vmem:[#allocation5 + $0xb0] sm:$0xff]  ;;  %v81_v29 = vld [vmem:[#allocation5 + $0x28] sm:$0xff] }
  0x3e   :  { %937 = vmatmul.mubr.msk.f32.vlgmr.msra.gmra.mxu0 %vm150_vm0, %v74_v17  ;;  %939 = vmatmul.mubr.msk.f32.vlgmr.msra.gmra.mxu1 %vm150_vm0, %v74_v17  ;;  %v91_v30 = vld [vmem:[#allocation5 + $0x78] sm:$0xff]  ;;  %v80_v31 = vld [vmem:[#allocation5 + $0x20] sm:$0xff]  ;;  %v90_v32 = vld [vmem:[#allocation5 + $0x70] sm:$0xff] }
  0x3f   :  { %227 = vmatprep.mubr.f32.mxu0 %v1256_v0  ;;  %335 = vmatprep.subr.mxu0 %v105_v18  ;;  %v83_v33 = vld [vmem:[#allocation5 + $0x38] sm:$0xff]  ;;  %v82_v34 = vld [vmem:[#allocation5 + $0x30] sm:$0xff]  ;;  %v512_v35 = vld [vmem:[#allocation8 + $0xf8] sm:$0xff] }
  0x40   :  { %336 = vmatpush1.msra.mxu0 %v104_v19  ;;  %304 = vmatprep.mubr.f32.mxu1 %v1256_v0  ;;  %v544_v36 = vld [vmem:[#allocation8 + $0x1f8] sm:$0xff]  ;;  %v511_v39 = vld [vmem:[#allocation8 + $0xf0] sm:$0xff]  ;;  %v510_v43 = vld [vmem:[#allocation8 + $0xe8] sm:$0xff] }
  0x41   :  { %337 = vmatprep.subr.mxu0 %v97_v20  ;;  %412 = vmatprep.subr.mxu1 %v107_v21  ;;  %v496_v37 = vld [vmem:[#allocation8 + $0x78] sm:$0xff]  ;;  %v543_v40 = vld [vmem:[#allocation8 + $0x1f0] sm:$0xff]  ;;  %v542_v44 = vld [vmem:[#allocation8 + $0x1e8] sm:$0xff] }
  0x42   :  { %938 = vmatmul.mubr.msk.f32.gmra.mxu0 %vm150_vm0, %v75_v22  ;;  %940 = vmatmul.mubr.msk.f32.gmra.mxu1 %vm150_vm0, %v75_v22  ;;  %v528_v38 = vld [vmem:[#allocation8 + $0x178] sm:$0xff]  ;;  %v495_v41 = vld [vmem:[#allocation8 + $0x70] sm:$0xff]  ;;  %v494_v45 = vld [vmem:[#allocation8 + $0x68] sm:$0xff] }
  0x43   :  { %338 = vmatpush1.msra.mxu0 %v96_v23  ;;  %413 = vmatpush1.msra.mxu1 %v106_v24  ;;  %v527_v42 = vld [vmem:[#allocation8 + $0x170] sm:$0xff]  ;;  %v526_v46 = vld [vmem:[#allocation8 + $0x168] sm:$0xff]  ;;  %v509_v47 = vld [vmem:[#allocation8 + $0xe0] sm:$0xff] }
  0x44   :  { %339 = vmatprep.subr.mxu0 %v89_v25  ;;  %414 = vmatprep.subr.mxu1 %v99_v26  ;;  %v541_v48 = vld [vmem:[#allocation8 + $0x1e0] sm:$0xff]  ;;  %v508_v51 = vld [vmem:[#allocation8 + $0xd8] sm:$0xff]  ;;  %v507_v55 = vld [vmem:[#allocation8 + $0xd0] sm:$0xff] }
  0x45   :  { %340 = vmatpush1.msra.mxu0 %v88_v27  ;;  %415 = vmatpush1.msra.mxu1 %v98_v28  ;;  %v493_v49 = vld [vmem:[#allocation8 + $0x60] sm:$0xff]  ;;  %v540_v52 = vld [vmem:[#allocation8 + $0x1d8] sm:$0xff]  ;;  %v539_v56 = vld [vmem:[#allocation8 + $0x1d0] sm:$0xff] }
  0x46   :  { %341 = vmatprep.subr.mxu0 %v81_v29  ;;  %416 = vmatprep.subr.mxu1 %v91_v30  ;;  %v525_v50 = vld [vmem:[#allocation8 + $0x160] sm:$0xff]  ;;  %v492_v53 = vld [vmem:[#allocation8 + $0x58] sm:$0xff]  ;;  %v491_v57 = vld [vmem:[#allocation8 + $0x50] sm:$0xff] }
  0x47   :  { %342 = vmatpush1.msra.mxu0 %v80_v31  ;;  %375 = vmatprep.mubr.f32.mxu0 %v1256_v0  ;;  %v524_v54 = vld [vmem:[#allocation8 + $0x158] sm:$0xff]  ;;  %v523_v58 = vld [vmem:[#allocation8 + $0x150] sm:$0xff]  ;;  %v506_v59 = vld [vmem:[#allocation8 + $0xc8] sm:$0xff] }
  0x48   :  { %417 = vmatpush1.msra.mxu1 %v90_v32  ;;  %941 = vmatmul.mubr.msk.f32.vlgmr.msra.gmra.mxu0 %vm150_vm0, %v74_v17  ;;  %v538_v60 = vld [vmem:[#allocation8 + $0x1c8] sm:$0xff]  ;;  %v505_v63 = vld [vmem:[#allocation8 + $0xc0] sm:$0xff]  ;;  %v504_v3 = vld [vmem:[#allocation8 + $0xb8] sm:$0xff] }
  0x49   :  { %418 = vmatprep.subr.mxu1 %v83_v33  ;;  %452 = vmatprep.mubr.f32.mxu1 %v1256_v0  ;;  %v490_v61 = vld [vmem:[#allocation8 + $0x48] sm:$0xff]  ;;  %v489_v1 = vld [vmem:[#allocation8 + $0x40] sm:$0xff]  ;;  %v536_v4 = vld [vmem:[#allocation8 + $0x1b8] sm:$0xff] }
  0x4a   :  { %419 = vmatpush1.msra.mxu1 %v82_v34  ;;  %381 = vmatprep.mubr.f32.mxu0 %v1256_v0  ;;  %v522_v62 = vld [vmem:[#allocation8 + $0x148] sm:$0xff]  ;;  %v521_v2 = vld [vmem:[#allocation8 + $0x140] sm:$0xff]  ;;  %v488_v5 = vld [vmem:[#allocation8 + $0x38] sm:$0xff] }
  0x4b   :  { %943 = vmatmul.mubr.msk.f32.vlgmr.msra.gmra.mxu1 %vm150_vm0, %v74_v17  ;;  %946 = vmatprep.subr.mxu0 %v512_v35  ;;  %v520_v6 = vld [vmem:[#allocation8 + $0x138] sm:$0xff]  ;;  %v503_v7 = vld [vmem:[#allocation8 + $0xb0] sm:$0xff]  ;;  %v502_v11 = vld [vmem:[#allocation8 + $0xa8] sm:$0xff] }
  0x4c   :  { %942 = vmatmul.mubr.msk.f32.gmra.mxu0 %vm150_vm0, %v75_v22  ;;  %458 = vmatprep.mubr.f32.mxu1 %v1256_v0  ;;  %v537_v0 = vld [vmem:[#allocation8 + $0x1c0] sm:$0xff]  ;;  %v535_v8 = vld [vmem:[#allocation8 + $0x1b0] sm:$0xff]  ;;  %v534_v12 = vld [vmem:[#allocation8 + $0x1a8] sm:$0xff] }
  0x4d   :  { %984 = vmatprep.subr.mxu1 %v544_v36  ;;  %947 = vmatpush3.msra.mxu0 %v496_v37  ;;  %v487_v9 = vld [vmem:[#allocation8 + $0x30] sm:$0xff]  ;;  %v486_v13 = vld [vmem:[#allocation8 + $0x28] sm:$0xff]  ;;  %v501_v15 = vld [vmem:[#allocation8 + $0xa0] sm:$0xff]  ;;  %v110_v37 = vlaneseq }
  0x4e   :  { %985 = vmatpush3.msra.mxu1 %v528_v38  ;;  %948 = vmatprep.subr.mxu0 %v511_v39  ;;  %v519_v10 = vld [vmem:[#allocation8 + $0x130] sm:$0xff]  ;;  %v518_v14 = vld [vmem:[#allocation8 + $0x128] sm:$0xff]  ;;  %v533_v16 = vld [vmem:[#allocation8 + $0x1a0] sm:$0xff] }
  0x4f   :  { %944 = vmatmul.mubr.msk.f32.gmra.mxu1 %vm150_vm0, %v75_v22  ;;  %986 = vmatprep.subr.mxu1 %v543_v40  ;;  %v485_v17 = vld [vmem:[#allocation8 + $0x20] sm:$0xff]  ;;  %v500_v19 = vld [vmem:[#allocation8 + $0x98] sm:$0xff]  ;;  %v499_v23 = vld [vmem:[#allocation8 + $0x90] sm:$0xff]  ;;  %v1322_v38 = vshrl.u32 %v110_v37, 7 }
  0x50   :  { %949 = vmatpush3.msra.mxu0 %v495_v41  ;;  %987 = vmatpush3.msra.mxu1 %v527_v42  ;;  %v517_v18 = vld [vmem:[#allocation8 + $0x120] sm:$0xff]  ;;  %v532_v20 = vld [vmem:[#allocation8 + $0x198] sm:$0xff]  ;;  %v531_v24 = vld [vmem:[#allocation8 + $0x190] sm:$0xff] }
  0x51   :  { %950 = vmatprep.subr.mxu0 %v510_v43  ;;  %988 = vmatprep.subr.mxu1 %v542_v44  ;;  %v484_v21 = vld [vmem:[#allocation8 + $0x18] sm:$0xff]  ;;  %v483_v25 = vld [vmem:[#allocation8 + $0x10] sm:$0xff]  ;;  %v498_v27 = vld [vmem:[#allocation8 + $0x88] sm:$0xff]  ;;  %v112_v39 = vsub.s32 0, %v1322_v38  ;;  %v120_v40 = vsub.s32 2, %v1322_v38  ;;  %v116_v42 = vsub.s32 1, %v1322_v38 }
  0x52   :  { %951 = vmatpush3.msra.mxu0 %v494_v45  ;;  %989 = vmatpush3.msra.mxu1 %v526_v46  ;;  %v516_v22 = vld [vmem:[#allocation8 + $0x118] sm:$0xff]  ;;  %v515_v26 = vld [vmem:[#allocation8 + $0x110] sm:$0xff]  ;;  %v530_v28 = vld [vmem:[#allocation8 + $0x188] sm:$0xff]  ;;  %v124_v43 = vsub.s32 3, %v1322_v38 }
  0x53   :  { %952 = vmatprep.subr.mxu0 %v509_v47  ;;  %990 = vmatprep.subr.mxu1 %v541_v48  ;;  %v482_v29 = vld [vmem:[#allocation8 + $0x8] sm:$0xff]  ;;  %v497_v31 = vld [vmem:[#allocation8 + $0x80] sm:$0xff]  ;;  %v576_v35 = vld [vmem:[#allocation8 + $0x2f8] sm:$0xff] }
  0x54   :  { %953 = vmatpush3.msra.mxu0 %v493_v49  ;;  %991 = vmatpush3.msra.mxu1 %v525_v50  ;;  %v514_v30 = vld [vmem:[#allocation8 + $0x108] sm:$0xff]  ;;  %v529_v32 = vld [vmem:[#allocation8 + $0x180] sm:$0xff]  ;;  %v608_v36 = vld [vmem:[#allocation8 + $0x3f8] sm:$0xff] }
  0x55   :  { %954 = vmatprep.subr.mxu0 %v508_v51  ;;  %992 = vmatprep.subr.mxu1 %v540_v52  ;;  %v481_v33 = vld [vmem:[#allocation8] sm:$0xff]  ;;  %v1326_v41 = vld [vmem:[#allocation7] sm:$0xff] }
  0x56   :  { %955 = vmatpush3.msra.mxu0 %v492_v53  ;;  %993 = vmatpush3.msra.mxu1 %v524_v54  ;;  %v513_v34 = vld [vmem:[#allocation8 + $0x100] sm:$0xff]  ;;  %v113_v44 = vrot.slane %v1326_v41, %v112_v39  ;;  %v1332_v45 = vrot.slane %v1326_v41, %v120_v40  ;;  %v117_v46 = vrot.slane %v1326_v41, %v116_v42  ;;  %v602_v39 = vld [vmem:[#allocation8 + $0x3c8] sm:$0xff] }
  0x57   :  { %956 = vmatprep.subr.mxu0 %v507_v55  ;;  %994 = vmatprep.subr.mxu1 %v539_v56  ;;  %v125_v47 = vrot.slane %v1326_v41, %v124_v43  ;;  %v554_v40 = vld [vmem:[#allocation8 + $0x248] sm:$0xff] }
  0x58   :  { %957 = vmatpush3.msra.mxu0 %v491_v57  ;;  %995 = vmatpush3.msra.mxu1 %v523_v58  ;;  %v586_v43 = vld [vmem:[#allocation8 + $0x348] sm:$0xff] }
  0x59   :  { %958 = vmatprep.subr.mxu0 %v506_v59  ;;  %996 = vmatprep.subr.mxu1 %v538_v60 }
  0x5a   :  { %959 = vmatpush3.msra.mxu0 %v490_v61  ;;  %997 = vmatpush3.msra.mxu1 %v522_v62  ;;  %v560_v61 = vld [vmem:[#allocation8 + $0x278] sm:$0xff] }
  0x5b   :  { %960 = vmatprep.subr.mxu0 %v505_v63  ;;  %998 = vmatprep.subr.mxu1 %v537_v0  ;;  %v592_v63 = vld [vmem:[#allocation8 + $0x378] sm:$0xff]  ;;  %v575_v0 = vld [vmem:[#allocation8 + $0x2f0] sm:$0xff] }
  0x5c   :  { %961 = vmatpush3.msra.mxu0 %v489_v1  ;;  %999 = vmatpush3.msra.mxu1 %v521_v2  ;;  %v607_v2 = vld [vmem:[#allocation8 + $0x3f0] sm:$0xff] }
  0x5d   :  { %962 = vmatprep.subr.mxu0 %v504_v3  ;;  %1000 = vmatprep.subr.mxu1 %v536_v4  ;;  %v559_v3 = vld [vmem:[#allocation8 + $0x270] sm:$0xff] }
  0x5e   :  { %963 = vmatpush3.msra.mxu0 %v488_v5  ;;  %1001 = vmatpush3.msra.mxu1 %v520_v6  ;;  %v591_v5 = vld [vmem:[#allocation8 + $0x370] sm:$0xff]  ;;  %v574_v6 = vld [vmem:[#allocation8 + $0x2e8] sm:$0xff] }
  0x5f   :  { %964 = vmatprep.subr.mxu0 %v503_v7  ;;  %1002 = vmatprep.subr.mxu1 %v535_v8  ;;  %v606_v8 = vld [vmem:[#allocation8 + $0x3e8] sm:$0xff] }
  0x60   :  { %965 = vmatpush3.msra.mxu0 %v487_v9  ;;  %1003 = vmatpush3.msra.mxu1 %v519_v10  ;;  %v558_v10 = vld [vmem:[#allocation8 + $0x268] sm:$0xff] }
  0x61   :  { %966 = vmatprep.subr.mxu0 %v502_v11  ;;  %1004 = vmatprep.subr.mxu1 %v534_v12  ;;  %v590_v12 = vld [vmem:[#allocation8 + $0x368] sm:$0xff] }
  0x62   :  { %967 = vmatpush3.msra.mxu0 %v486_v13  ;;  %1005 = vmatpush3.msra.mxu1 %v518_v14  ;;  %v573_v13 = vld [vmem:[#allocation8 + $0x2e0] sm:$0xff] }
  0x63   :  { %968 = vmatprep.subr.mxu0 %v501_v15  ;;  %1006 = vmatprep.subr.mxu1 %v533_v16  ;;  %v605_v15 = vld [vmem:[#allocation8 + $0x3e0] sm:$0xff] }
  0x64   :  { %969 = vmatpush3.msra.mxu0 %v485_v17  ;;  %1007 = vmatpush3.msra.mxu1 %v517_v18  ;;  %v557_v16 = vld [vmem:[#allocation8 + $0x260] sm:$0xff]  ;;  %v132_v17 = vsub.s32 5, %v1322_v38 }
  0x65   :  { %970 = vmatprep.subr.mxu0 %v500_v19  ;;  %1008 = vmatprep.subr.mxu1 %v532_v20  ;;  %v589_v19 = vld [vmem:[#allocation8 + $0x360] sm:$0xff]  ;;  %v572_v20 = vld [vmem:[#allocation8 + $0x2d8] sm:$0xff] }
  0x66   :  { %971 = vmatpush3.msra.mxu0 %v484_v21  ;;  %1009 = vmatpush3.msra.mxu1 %v516_v22  ;;  %v128_v21 = vsub.s32 4, %v1322_v38 }
  0x67   :  { %972 = vmatprep.subr.mxu0 %v499_v23  ;;  %1010 = vmatprep.subr.mxu1 %v531_v24  ;;  %v604_v23 = vld [vmem:[#allocation8 + $0x3d8] sm:$0xff] }
  0x68   :  { %973 = vmatpush3.msra.mxu0 %v483_v25  ;;  %1011 = vmatpush3.msra.mxu1 %v515_v26  ;;  %v556_v24 = vld [vmem:[#allocation8 + $0x258] sm:$0xff]  ;;  %v136_v25 = vsub.s32 6, %v1322_v38 }
  0x69   :  { %974 = vmatprep.subr.mxu0 %v498_v27  ;;  %1012 = vmatprep.subr.mxu1 %v530_v28  ;;  %v588_v28 = vld [vmem:[#allocation8 + $0x358] sm:$0xff] }
  0x6a   :  { %975 = vmatpush3.msra.mxu0 %v482_v29  ;;  %1013 = vmatpush3.msra.mxu1 %v514_v30  ;;  %v571_v29 = vld [vmem:[#allocation8 + $0x2d0] sm:$0xff]  ;;  %v140_v30 = vsub.s32 7, %v1322_v38  ;;  %v137_v38 = vrot.slane %v1326_v41, %v136_v25 }
  0x6b   :  { %976 = vmatprep.subr.mxu0 %v497_v31  ;;  %1014 = vmatprep.subr.mxu1 %v529_v32  ;;  %v603_v31 = vld [vmem:[#allocation8 + $0x3d0] sm:$0xff] }
  0x6c   :  { %977 = vmatpush3.msra.mxu0 %v481_v33  ;;  %1015 = vmatpush3.msra.mxu1 %v513_v34  ;;  %v555_v32 = vld [vmem:[#allocation8 + $0x250] sm:$0xff]  ;;  %v133_v33 = vrot.slane %v1326_v41, %v132_v17  ;;  %v1348_v34 = vrot.slane %v1326_v41, %v128_v21  ;;  %v580_v17 = vld [vmem:[#allocation8 + $0x318] sm:$0xff] }
  0x6d   :  { %1022 = vmatprep.subr.mxu0 %v576_v35  ;;  %1060 = vmatprep.subr.mxu1 %v608_v36  ;;  %v587_v35 = vld [vmem:[#allocation8 + $0x350] sm:$0xff]  ;;  %v570_v36 = vld [vmem:[#allocation8 + $0x2c8] sm:$0xff] }
  0x6e   :  { %v579_v21 = vld [vmem:[#allocation8 + $0x310] sm:$0xff] }
  0xfe   :  { %v223_v48 = vpop.f32.mrf.mxu0  ;;  %v300_v49 = vpop.f32.mrf.mxu1 }
  0xff   :  { %v224_v50 = vadd.f32 %v223_v48, %v113_v44  ;;  %v301_v51 = vadd.f32 %v300_v49, %v1332_v45  ;;  %v553_v48 = vld [vmem:[#allocation8 + $0x240] sm:$0xff] }
 0x100   :  { %v225_v52 = vpop.f32.mrf.mxu0  ;;  %v302_v53 = vpop.f32.mrf.mxu1 }
 0x101   :  { %1108 = vtanh.f32 %v224_v50  ;;  %v226_v54 = vadd.f32 %v225_v52, %v117_v46  ;;  %v303_v55 = vadd.f32 %v302_v53, %v125_v47  ;;  %v585_v50 = vld [vmem:[#allocation8 + $0x340] sm:$0xff]  ;;  %v568_v52 = vld [vmem:[#allocation8 + $0x2b8] sm:$0xff] }
 0x102   :  { %1110 = vtanh.f32 %v301_v51  ;;  %v229_v56 = vpop.f32.mrf.mxu0  ;;  %v306_v58 = vpop.f32.mrf.mxu1 }
 0x103   :  { %1112 = vtanh.f32 %v226_v54  ;;  %v230_v14 = vadd.f32 %v229_v56, %v113_v44  ;;  %v307_v27 = vadd.f32 %v306_v58, %v1332_v45  ;;  %v141_v44 = vrot.slane %v1326_v41, %v140_v30  ;;  %v569_v45 = vld [vmem:[#allocation8 + $0x2c0] sm:$0xff]  ;;  %v600_v54 = vld [vmem:[#allocation8 + $0x3b8] sm:$0xff]  ;;  %v567_v58 = vld [vmem:[#allocation8 + $0x2b0] sm:$0xff] }
 0x104   :  { %1114 = vtanh.f32 %v303_v55  ;;  %v231_v1 = vpop.f32.mrf.mxu0  ;;  %v308_v4 = vpop.f32.mrf.mxu1  ;;  %v552_v41 = vld [vmem:[#allocation8 + $0x238] sm:$0xff] }
 0x105   :  { %v232_v9 = vadd.f32 %v231_v1, %v117_v46  ;;  %v309_v18 = vadd.f32 %v308_v4, %v125_v47  ;;  %v601_v47 = vld [vmem:[#allocation8 + $0x3c0] sm:$0xff]  ;;  %v598_v1 = vld [vmem:[#allocation8 + $0x3a8] sm:$0xff] }
 0x106   :  { %v582_v4 = vld [vmem:[#allocation8 + $0x328] sm:$0xff] }
 0x107   :  { %1116 = vtanh.f32 %v232_v9 }
 0x108   :  { %v1337_v7 = vpop.f32.mrf.mxu0  ;;  %1118 = vtanh.f32 %v230_v14  ;;  %v596_v14 = vld [vmem:[#allocation8 + $0x398] sm:$0xff] }
 0x109   :  { %1120 = vtanh.f32 %v309_v18  ;;  %v378_v49 = vadd.f32 %v1337_v7, %v1348_v34  ;;  %v597_v7 = vld [vmem:[#allocation8 + $0x3a0] sm:$0xff]  ;;  %v563_v18 = vld [vmem:[#allocation8 + $0x290] sm:$0xff] }
 0x10a   :  { %v379_v22 = vpop.f32.mrf.mxu0  ;;  %1122 = vtanh.f32 %v307_v27 }
 0x10b   :  { %v1339_v11 = vpop.f32.mrf.mxu1  ;;  %v380_v46 = vadd.f32 %v379_v22, %v133_v33  ;;  %v562_v22 = vld [vmem:[#allocation8 + $0x288] sm:$0xff] }
 0x10c   :  { %v1350_v37 = vpop.f32.mrf.mxu0  ;;  %v455_v53 = vadd.f32 %v1339_v11, %v137_v38 }
 0x10d   :  { %v456_v26 = vpop.f32.mrf.mxu1  ;;  %1124 = vtanh.f32 %v380_v46  ;;  %v384_v9 = vadd.f32 %v1350_v37, %v1348_v34  ;;  %v945_v46 = vld [vmem:[%s1372_s4] ss:$0 sm:$0xff]  ;;  %s1257_s4 = smov [#allocation10]  }
 0x10e   :  { %v1109_v57 = vpop.eup %1108  ;;  %v385_v51 = vpop.f32.mrf.mxu0  ;;  %v457_v56 = vadd.f32 %v456_v26, %v141_v44  ;;  %1126 = vtanh.f32 %v378_v49  ;;  %v578_v26 = vld [vmem:[#allocation8 + $0x308] sm:$0xff]  ;;  %s923_s15 = sshll.u32 %s1257_s4, 4  ;;  %s924_s15 = int_to_ptr.vmem [resolvable:$true] %s923_s15 }
 0x10f   :  { %v1111_v59 = vpop.eup %1110  ;;  %v460_v42 = vpop.f32.mrf.mxu1  ;;  %1128 = vtanh.f32 %v455_v53  ;;  %s1220_s16 = scalar_lea.vmem %s924_s15, 256  ;;  %p1225_p7 = scmp.lt.s32.totalorder %s924_s15, %s924_s15 }
 0x110   :  { %v1113_v60 = vpop.eup %1112  ;;  %1130 = vtanh.f32 %v457_v56  ;;  %p1221_p6 = scmp.ne.s32.totalorder %s924_s15, %s1220_s16  ;;  %p1226_p8 = scmp.lt.s32.totalorder %s1220_s16, %s1220_s16 }
 0x111   :  { %v1115_v62 = vpop.eup %1114  ;;  %680 = vmatprep.mubr.f32.mxu0 %v1113_v60  ;;  %v462_v55 = vpop.f32.mrf.mxu1  ;;  %v599_v60 = vld [vmem:[#allocation8 + $0x3b0] sm:$0xff] }
 0x112   :  { %755 = vmatprep.mubr.f32.mxu1 %v1115_v62  ;;  %681 = vmatmul.mubr.f32.vlgmr.msra.gmra.mxu0 %v1109_v57  ;;  %v584_v57 = vld [vmem:[#allocation8 + $0x338] sm:$0xff]  ;;  %v463_v62 = vadd.f32 %v462_v55, %v141_v44  ;;  %p1227_p9 = por %p1226_p8, %p1225_p7 }
 0x113   :  { %756 = vmatmul.mubr.f32.vlgmr.msra.gmra.mxu1 %v1111_v59  ;;  %1023 = vmatpush3.msra.mxu0 %v560_v61  ;;  %v386_v59 = vadd.f32 %v385_v51, %v133_v33  ;;  %v551_v61 = vld [vmem:[#allocation8 + $0x230] sm:$0xff] }
 0x114   :  { %1061 = vmatpush3.msra.mxu1 %v592_v63  ;;  %1024 = vmatprep.subr.mxu0 %v575_v0  ;;  %v583_v63 = vld [vmem:[#allocation8 + $0x330] sm:$0xff]  ;;  %v566_v0 = vld [vmem:[#allocation8 + $0x2a8] sm:$0xff]  ;;  %p1228_p10 = pnand %p1227_p9, %p1221_p6 }
 0x115   :  { %1062 = vmatprep.subr.mxu1 %v607_v2  ;;  %1025 = vmatpush3.msra.mxu0 %v559_v3  ;;  %v550_v2 = vld [vmem:[#allocation8 + $0x228] sm:$0xff]  ;;  %v1117_v3 = vpop.eup %1116  ;;  %1132 = vtanh.f32 %v386_v59 }
 0x116   :  { %1063 = vmatpush3.msra.mxu1 %v591_v5  ;;  %1026 = vmatprep.subr.mxu0 %v574_v6  ;;  %v461_v5 = vadd.f32 %v460_v42, %v137_v38  ;;  %v565_v6 = vld [vmem:[#allocation8 + $0x2a0] sm:$0xff]  ;;  %1134 = vtanh.f32 %v463_v62 }
 0x117   :  { %1064 = vmatprep.subr.mxu1 %v606_v8  ;;  %1027 = vmatpush3.msra.mxu0 %v558_v10  ;;  %v1119_v8 = vpop.eup %1118  ;;  %v581_v10 = vld [vmem:[#allocation8 + $0x320] sm:$0xff] }
 0x118   :  { %1065 = vmatpush3.msra.mxu1 %v590_v12  ;;  %1028 = vmatprep.subr.mxu0 %v573_v13  ;;  %v1121_v11 = vpop.eup %1120  ;;  %v549_v12 = vld [vmem:[#allocation8 + $0x220] sm:$0xff]  ;;  %v564_v13 = vld [vmem:[#allocation8 + $0x298] sm:$0xff]  ;;  %1136 = vtanh.f32 %v461_v5 }
 0x119   :  { %1066 = vmatprep.subr.mxu1 %v605_v15  ;;  %1029 = vmatpush3.msra.mxu0 %v557_v16  ;;  %v1123_v15 = vpop.eup %1122  ;;  %v548_v16 = vld [vmem:[#allocation8 + $0x218] sm:$0xff]  ;;  %1138 = vtanh.f32 %v384_v9 }
 0x11a   :  { %1067 = vmatpush3.msra.mxu1 %v589_v19  ;;  %1030 = vmatprep.subr.mxu0 %v572_v20  ;;  %v595_v19 = vld [vmem:[#allocation8 + $0x390] sm:$0xff]  ;;  %v1125_v25 = vpop.eup %1124 }
 0x11b   :  { %1068 = vmatprep.subr.mxu1 %v604_v23  ;;  %1031 = vmatpush3.msra.mxu0 %v556_v24  ;;  %v547_v20 = vld [vmem:[#allocation8 + $0x210] sm:$0xff]  ;;  %v594_v23 = vld [vmem:[#allocation8 + $0x388] sm:$0xff]  ;;  %v1127_v27 = vpop.eup %1126 }
 0x11c   :  { %1069 = vmatpush3.msra.mxu1 %v588_v28  ;;  %1032 = vmatprep.subr.mxu0 %v571_v29  ;;  %v546_v24 = vld [vmem:[#allocation8 + $0x208] sm:$0xff]  ;;  %v561_v28 = vld [vmem:[#allocation8 + $0x280] sm:$0xff]  ;;  %v1129_v30 = vpop.eup %1128 }
 0x11d   :  { %1070 = vmatprep.subr.mxu1 %v603_v31  ;;  %1033 = vmatpush3.msra.mxu0 %v555_v32  ;;  %v593_v29 = vld [vmem:[#allocation8 + $0x380] sm:$0xff]  ;;  %v1131_v33 = vpop.eup %1130 }
 0x11e   :  { %1071 = vmatpush3.msra.mxu1 %v587_v35  ;;  %1034 = vmatprep.subr.mxu0 %v570_v36  ;;  %v545_v31 = vld [vmem:[#allocation8 + $0x200] sm:$0xff] }
 0x11f   :  { %1072 = vmatprep.subr.mxu1 %v602_v39  ;;  %1035 = vmatpush3.msra.mxu0 %v554_v40  ;;  %v577_v32 = vld [vmem:[#allocation8 + $0x300] sm:$0xff] }
 0x120   :  { %1073 = vmatpush3.msra.mxu1 %v586_v43  ;;  %1036 = vmatprep.subr.mxu0 %v569_v45 }
 0x121   :  { %1074 = vmatprep.subr.mxu1 %v601_v47  ;;  %1037 = vmatpush3.msra.mxu0 %v553_v48 }
 0x122   :  { %1075 = vmatpush3.msra.mxu1 %v585_v50  ;;  %1038 = vmatprep.subr.mxu0 %v568_v52  ;;  %v1133_v34 = vpop.eup %1132 }
 0x123   :  { %1076 = vmatprep.subr.mxu1 %v600_v54  ;;  %1039 = vmatpush3.msra.mxu0 %v552_v41  ;;  %v1135_v35 = vpop.eup %1134 }
 0x124   :  { %1077 = vmatpush3.msra.mxu1 %v584_v57  ;;  %1040 = vmatprep.subr.mxu0 %v567_v58 }
 0x125   :  { %1078 = vmatprep.subr.mxu1 %v599_v60  ;;  %1041 = vmatpush3.msra.mxu0 %v551_v61  ;;  %v1137_v36 = vpop.eup %1136 }
 0x126   :  { %1079 = vmatpush3.msra.mxu1 %v583_v63  ;;  %1042 = vmatprep.subr.mxu0 %v566_v0  ;;  %v1139_v37 = vpop.eup %1138 }
 0x127   :  { %1080 = vmatprep.subr.mxu1 %v598_v1  ;;  %1043 = vmatpush3.msra.mxu0 %v550_v2 }
 0x128   :  { %1081 = vmatpush3.msra.mxu1 %v582_v4  ;;  %685 = vmatprep.mubr.f32.mxu0 %v1117_v3 }
 0x129   :  { %1044 = vmatprep.subr.mxu0 %v565_v6  ;;  %1082 = vmatprep.subr.mxu1 %v597_v7 }
 0x12a   :  { %686 = vmatmul.mubr.f32.gmra.mxu0 %v1119_v8  ;;  %1083 = vmatpush3.msra.mxu1 %v581_v10 }
 0x12b   :  { %1045 = vmatpush3.msra.mxu0 %v549_v12  ;;  %760 = vmatprep.mubr.f32.mxu1 %v1121_v11 }
 0x12c   :  { %1046 = vmatprep.subr.mxu0 %v564_v13  ;;  %1084 = vmatprep.subr.mxu1 %v596_v14 }
 0x12d   :  { %761 = vmatmul.mubr.f32.gmra.mxu1 %v1123_v15  ;;  %1047 = vmatpush3.msra.mxu0 %v548_v16 }
 0x12e   :  { %1085 = vmatpush3.msra.mxu1 %v580_v17  ;;  %1048 = vmatprep.subr.mxu0 %v563_v18 }
 0x12f   :  { %1086 = vmatprep.subr.mxu1 %v595_v19  ;;  %1049 = vmatpush3.msra.mxu0 %v547_v20 }
 0x130   :  { %1087 = vmatpush3.msra.mxu1 %v579_v21  ;;  %1050 = vmatprep.subr.mxu0 %v562_v22 }
 0x131   :  { %1088 = vmatprep.subr.mxu1 %v594_v23  ;;  %1051 = vmatpush3.msra.mxu0 %v546_v24 }
 0x132   :  { %830 = vmatprep.mubr.f32.mxu0 %v1125_v25  ;;  %1089 = vmatpush3.msra.mxu1 %v578_v26 }
 0x133   :  { %1052 = vmatprep.subr.mxu0 %v561_v28  ;;  %1090 = vmatprep.subr.mxu1 %v593_v29 }
 0x134   :  { %1053 = vmatpush3.msra.mxu0 %v545_v31  ;;  %1091 = vmatpush3.msra.mxu1 %v577_v32 }
 0x135   :  { %905 = vmatprep.mubr.f32.mxu1 %v1131_v33  ;;  %831 = vmatmul.mubr.f32.vlgmr.msra.gmra.mxu0 %v1127_v27 }
 0x136   :  { %906 = vmatmul.mubr.f32.vlgmr.msra.gmra.mxu1 %v1129_v30  ;;  %835 = vmatprep.mubr.f32.mxu0 %v1133_v34 }
 0x137   :  { %910 = vmatprep.mubr.f32.mxu1 %v1135_v35 }
 0x139   :  { %836 = vmatmul.mubr.f32.gmra.mxu0 %v1139_v37 }
 0x13a   :  { %911 = vmatmul.mubr.f32.gmra.mxu1 %v1137_v36 }
 0x1d2   :  { %v978_v38 = vpop.f32.mrf.mxu0 }
 0x1d3   :  { %v1016_v39 = vpop.f32.mrf.mxu1 }
 0x1d4   :  { %v979_v40 = vpop.f32.mrf.mxu0 }
 0x1d5   :  { %v1017_v43 = vpop.f32.mrf.mxu1  ;;  %v980_v44 = vadd.f32 %v979_v40, %v978_v38 }
 0x1d6   :  { %v1018_v52 = vadd.f32 %v1017_v43, %v1016_v39 }
 0x1d7   :  { %v683_v48 = vadd.f32 %v980_v44, %v945_v46 }
 0x1d9   :  { %v758_v41 = vadd.f32 %v1018_v52, %v683_v48 }
 0x1ea   :  { %v981_v42 = vpop.f32.mrf.mxu0 }
 0x1ec   :  { %v982_v47 = vpop.f32.mrf.mxu0 }
 0x1ed   :  { %v1019_v45 = vpop.f32.mrf.mxu1  ;;  %v983_v49 = vadd.f32 %v982_v47, %v981_v42 }
 0x1ef   :  { %v1020_v50 = vpop.f32.mrf.mxu1  ;;  %v688_v55 = vadd.f32 %v983_v49, %v945_v46 }
 0x1f0   :  { %v1021_v56 = vadd.f32 %v1020_v50, %v1019_v45 }
 0x1f2   :  { %v763_v0 = vadd.f32 %v1021_v56, %v688_v55 }
 0x1f5   :  { %v1054_v51 = vpop.f32.mrf.mxu0 }
 0x1f6   :  { %v1092_v53 = vpop.f32.mrf.mxu1 }
 0x1f7   :  { %v1055_v54 = vpop.f32.mrf.mxu0 }
 0x1f8   :  { %v1056_v57 = vadd.f32 %v1055_v54, %v1054_v51  ;;  %v1093_v58 = vpop.f32.mrf.mxu1 }
 0x1f9   :  { %v1057_v59 = vpop.f32.mrf.mxu0  ;;  %v1094_v61 = vadd.f32 %v1093_v58, %v1092_v53 }
 0x1fa   :  { %v833_v60 = vadd.f32 %v1056_v57, %v758_v41  ;;  %v1095_v62 = vpop.f32.mrf.mxu1 }
 0x1fb   :  { %v1058_v63 = vpop.f32.mrf.mxu0 }
 0x1fc   :  { %v908_v1 = vadd.f32 %v1094_v61, %v833_v60  ;;  %v1059_v2 = vadd.f32 %v1058_v63, %v1057_v59  ;;  %v1096_v3 = vpop.f32.mrf.mxu1 }
 0x1fd   :  { %v1097_v5 = vadd.f32 %v1096_v3, %v1095_v62 }
 0x1fe   :  { %916 = vst [vmem:[#allocation10] sm:$0xff] %v908_v1  ;;  %v838_v4 = vadd.f32 %v1059_v2, %v763_v0 }
 0x200   :  { %v913_v6 = vadd.f32 %v1097_v5, %v838_v4 }
 0x202   :  { %917 = vst [vmem:[#allocation10 + $0x8] sm:$0xff] %v913_v6 }
 0x203   :  { %1231 = shalt.err (!%p1228_p10)
}
 0x204   :  { %929 = dma.vmem_to_hbm [thread:$0]  %s924_s15, 256, %s1373_s5, [#allocation4], %s1252_s28, %s1252_s28, %s1253_s29  }
 0x205   :  { %1246 = dma.done.wait [#allocation4], 256  }
 0x206   :  { %1247 = vsyncadd [#allocation4], 4294967040 }
 0x207   :  { %933 = vsyncpa [#allocation3], 1 }
 0x208   :  { %934 = vsyncpa [#allocation6], 1 }
 0x209   :  { %935 = vsyncpa [#allocation9], 1 }
 0x20a   :  { %936 = vsyncpa [#allocation4], 1 }

// kernel: tpu_custom_call.1
= control target key start
LH: loop header
LB: loop body
LE: loop exit
PB: predicated region body
PF: predicated region fallthrough
CT: control target
= control target key end

     0   :  { %10 = vsyncpa [#allocation3], 0  ;;  %s1368_s0 = inlined_call_operand.hbm [shape: f32[16,32], index: 0, kind: input, shape index: {}]   ;;  %s1369_s1 = inlined_call_operand.hbm [shape: f32[32,1024], index: 1, kind: input, shape index: {}]   ;;  %s1370_s2 = inlined_call_operand.hbm [shape: f32[1,1024], index: 2, kind: input, shape index: {}]   ;;  %s1371_s3 = inlined_call_operand.hbm [shape: f32[1024,128], index: 3, kind: input, shape index: {}]   ;;  %s1372_s4 = inlined_call_operand.vmem [shape: f32[1,128], index: 4, kind: input, shape index: {}]   ;;  %s1373_s5 = inlined_call_operand.hbm [shape: f32[16,128], index: 5, kind: output, shape index: {}]  }
   0x1   :  { %11 = vsyncpa [#allocation6], 0 }
   0x2   :  { %12 = vsyncpa [#allocation9], 0 }
   0x3   :  { %13 = vsyncpa [#allocation4], 0  ;;  %s1248_s18 = smov [#allocation5]  }
   0x4   :  { %s31_s19 = sshll.u32 %s1248_s18, 4  ;;  %s32_s19 = int_to_ptr.vmem [resolvable:$true] %s31_s19 }
   0x5   :  { %s1148_s20 = scalar_lea.vmem %s32_s19, 4096  ;;  %p1153_p1 = scmp.lt.s32.totalorder %s32_s19, %s32_s19 }
   0x6   :  { %p1149_p0 = scmp.ne.s32.totalorder %s32_s19, %s1148_s20  ;;  %p1154_p2 = scmp.lt.s32.totalorder %s1148_s20, %s1148_s20 }
   0x8   :  { %p1155_p3 = por %p1154_p2, %p1153_p1 }
   0xa   :  { %p1156_p4 = pnand %p1155_p3, %p1149_p0 }
   0xc   :  { %1159 = shalt.err (!%p1156_p4)
}
   0xd   :  { %s1249_s21 = smov 1024   ;;  %s1250_s22 = smov 64  }
   0xe   :  { %37 = dma.hbm_to_vmem [thread:$0]  %s1369_s1, 4096, %s32_s19, [#allocation6], %s1249_s21, %s1249_s21, %s1250_s22  }
   0xf   :  { %s1251_s25 = smov [#allocation2]  }
  0x10   :  { %s19_s26 = sshll.u32 %s1251_s25, 4  ;;  %s20_s26 = int_to_ptr.vmem [resolvable:$true] %s19_s26 }
  0x11   :  { %s1168_s27 = scalar_lea.vmem %s20_s26, 256  ;;  %p1173_p6 = scmp.lt.s32.totalorder %s20_s26, %s20_s26 }
  0x12   :  { %p1169_p5 = scmp.ne.s32.totalorder %s20_s26, %s1168_s27  ;;  %p1174_p7 = scmp.lt.s32.totalorder %s1168_s27, %s1168_s27 }
  0x14   :  { %p1175_p8 = por %p1174_p7, %p1173_p6 }
  0x16   :  { %p1176_p9 = pnand %p1175_p8, %p1169_p5 }
  0x18   :  { %1179 = shalt.err (!%p1176_p9)
}
  0x19   :  { %s1252_s28 = smov 128   ;;  %s1253_s29 = smov 8  }
  0x1a   :  { %25 = dma.hbm_to_vmem [thread:$0]  %s1368_s0, 256, %s20_s26, [#allocation3], %s1252_s28, %s1252_s28, %s1253_s29  }
  0x1b   :  { %s1254_s1 = smov [#allocation7]   ;;  %s1255_s8 = smov [#allocation8]  }
  0x1c   :  { %s44_s7 = sshll.u32 %s1254_s1, 4  ;;  %s53_s9 = sshll.u32 %s1255_s8, 4  ;;  %s45_s7 = int_to_ptr.vmem [resolvable:$true] %s44_s7  ;;  %s54_s9 = int_to_ptr.vmem [resolvable:$true] %s53_s9 }
  0x1d   :  { %s1188_s10 = scalar_lea.vmem %s45_s7, 128  ;;  %p1193_p11 = scmp.lt.s32.totalorder %s45_s7, %s45_s7 }
  0x1e   :  { %p1189_p10 = scmp.ne.s32.totalorder %s45_s7, %s1188_s10  ;;  %p1194_p12 = scmp.lt.s32.totalorder %s1188_s10, %s1188_s10 }
  0x20   :  { %p1195_p13 = por %p1194_p12, %p1193_p11 }
  0x22   :  { %p1196_p0 = pnand %p1195_p13, %p1189_p10 }
  0x24   :  { %1199 = shalt.err (!%p1196_p0)
}
  0x25   :  { %47 = dma.hbm_to_vmem [thread:$0]  %s1370_s2, 128, %s45_s7, [#allocation6]  }
  0x26   :  { %s1208_s13 = scalar_lea.vmem %s54_s9, 16384  ;;  %p1213_p2 = scmp.lt.s32.totalorder %s54_s9, %s54_s9 }
  0x27   :  { %p1209_p1 = scmp.ne.s32.totalorder %s54_s9, %s1208_s13  ;;  %p1214_p3 = scmp.lt.s32.totalorder %s1208_s13, %s1208_s13 }
  0x29   :  { %p1215_p4 = por %p1214_p3, %p1213_p2 }
  0x2b   :  { %p1216_p5 = pnand %p1215_p4, %p1209_p1 }
  0x2d   :  { %1219 = shalt.err (!%p1216_p5)
}
  0x2e   :  { %59 = dma.hbm_to_vmem [thread:$0]  %s1371_s3, 16384, %s54_s9, [#allocation9], %s1252_s28, %s1252_s28, %s1253_s29  }
  0x2f   :  { %1240 = dma.done.wait [#allocation3], 256  }
  0x30   :  { %1241 = vsyncadd [#allocation3], 4294967040 }
  0x31   :  { %1242 = dma.done.wait [#allocation6], 4224  }
  0x32   :  { %1243 = vsyncadd [#allocation6], 4294963072 }
  0x33   :  { %1244 = dma.done.wait [#allocation9], 16384  }
  0x34   :  { %1245 = vsyncadd [#allocation9], 4294950912  ;;  %v1256_v0 = vmov 0.0   ;;  %v101_v1 = vld [vmem:[#allocation5 + $0xc8] sm:$0xff]  ;;  %v103_v2 = vld [vmem:[#allocation5 + $0xd8] sm:$0xff]  ;;  %vm150_vm0 = vcmask 261120  }
  0x35   :  { %221 = vmatprep.mubr.f32.mxu0 %v1256_v0  ;;  %298 = vmatprep.mubr.f32.mxu1 %v1256_v0  ;;  %v100_v3 = vld [vmem:[#allocation5 + $0xc0] sm:$0xff]  ;;  %v102_v4 = vld [vmem:[#allocation5 + $0xd0] sm:$0xff]  ;;  %v93_v5 = vld [vmem:[#allocation5 + $0x88] sm:$0xff] }
  0x36   :  { %181 = vmatprep.subr.mxu0 %v101_v1  ;;  %258 = vmatprep.subr.mxu1 %v103_v2  ;;  %v95_v6 = vld [vmem:[#allocation5 + $0x98] sm:$0xff]  ;;  %v92_v7 = vld [vmem:[#allocation5 + $0x80] sm:$0xff]  ;;  %v94_v8 = vld [vmem:[#allocation5 + $0x90] sm:$0xff] }
  0x37   :  { %182 = vmatpush1.msra.mxu0 %v100_v3  ;;  %259 = vmatpush1.msra.mxu1 %v102_v4  ;;  %v85_v9 = vld [vmem:[#allocation5 + $0x48] sm:$0xff]  ;;  %v87_v10 = vld [vmem:[#allocation5 + $0x58] sm:$0xff]  ;;  %v84_v11 = vld [vmem:[#allocation5 + $0x40] sm:$0xff] }
  0x38   :  { %183 = vmatprep.subr.mxu0 %v93_v5  ;;  %260 = vmatprep.subr.mxu1 %v95_v6  ;;  %v86_v12 = vld [vmem:[#allocation5 + $0x50] sm:$0xff]  ;;  %v77_v13 = vld [vmem:[#allocation5 + $0x8] sm:$0xff]  ;;  %v79_v14 = vld [vmem:[#allocation5 + $0x18] sm:$0xff] }
  0x39   :  { %184 = vmatpush1.msra.mxu0 %v92_v7  ;;  %261 = vmatpush1.msra.mxu1 %v94_v8  ;;  %v76_v15 = vld [vmem:[#allocation5] sm:$0xff]  ;;  %v78_v16 = vld [vmem:[#allocation5 + $0x10] sm:$0xff]  ;;  %v105_v18 = vld [vmem:[#allocation5 + $0xe8] sm:$0xff] }
  0x3a   :  { %185 = vmatprep.subr.mxu0 %v85_v9  ;;  %262 = vmatprep.subr.mxu1 %v87_v10  ;;  %v74_v17 = vld [vmem:[#allocation2] sm:$0xff]  ;;  %v104_v19 = vld [vmem:[#allocation5 + $0xe0] sm:$0xff]  ;;  %v97_v20 = vld [vmem:[#allocation5 + $0xa8] sm:$0xff] }
  0x3b   :  { %186 = vmatpush1.msra.mxu0 %v84_v11  ;;  %263 = vmatpush1.msra.mxu1 %v86_v12  ;;  %v107_v21 = vld [vmem:[#allocation5 + $0xf8] sm:$0xff]  ;;  %v96_v23 = vld [vmem:[#allocation5 + $0xa0] sm:$0xff]  ;;  %v106_v24 = vld [vmem:[#allocation5 + $0xf0] sm:$0xff] }
  0x3c   :  { %187 = vmatprep.subr.mxu0 %v77_v13  ;;  %264 = vmatprep.subr.mxu1 %v79_v14  ;;  %v75_v22 = vld [vmem:[#allocation2 + $0x8] sm:$0xff]  ;;  %v89_v25 = vld [vmem:[#allocation5 + $0x68] sm:$0xff]  ;;  %v88_v27 = vld [vmem:[#allocation5 + $0x60] sm:$0xff] }
  0x3d   :  { %188 = vmatpush1.msra.mxu0 %v76_v15  ;;  %265 = vmatpush1.msra.mxu1 %v78_v16  ;;  %v99_v26 = vld [vmem:[#allocation5 + $0xb8] sm:$0xff]  ;;  %v98_v28 = vld [vmem:[#allocation5 + $0xb0] sm:$0xff]  ;;  %v81_v29 = vld [vmem:[#allocation5 + $0x28] sm:$0xff] }
  0x3e   :  { %937 = vmatmul.mubr.msk.f32.vlgmr.msra.gmra.mxu0 %vm150_vm0, %v74_v17  ;;  %939 = vmatmul.mubr.msk.f32.vlgmr.msra.gmra.mxu1 %vm150_vm0, %v74_v17  ;;  %v91_v30 = vld [vmem:[#allocation5 + $0x78] sm:$0xff]  ;;  %v80_v31 = vld [vmem:[#allocation5 + $0x20] sm:$0xff]  ;;  %v90_v32 = vld [vmem:[#allocation5 + $0x70] sm:$0xff] }
  0x3f   :  { %227 = vmatprep.mubr.f32.mxu0 %v1256_v0  ;;  %335 = vmatprep.subr.mxu0 %v105_v18  ;;  %v83_v33 = vld [vmem:[#allocation5 + $0x38] sm:$0xff]  ;;  %v82_v34 = vld [vmem:[#allocation5 + $0x30] sm:$0xff]  ;;  %v512_v35 = vld [vmem:[#allocation8 + $0xf8] sm:$0xff] }
  0x40   :  { %336 = vmatpush1.msra.mxu0 %v104_v19  ;;  %304 = vmatprep.mubr.f32.mxu1 %v1256_v0  ;;  %v544_v36 = vld [vmem:[#allocation8 + $0x1f8] sm:$0xff]  ;;  %v511_v39 = vld [vmem:[#allocation8 + $0xf0] sm:$0xff]  ;;  %v510_v43 = vld [vmem:[#allocation8 + $0xe8] sm:$0xff] }
  0x41   :  { %337 = vmatprep.subr.mxu0 %v97_v20  ;;  %412 = vmatprep.subr.mxu1 %v107_v21  ;;  %v496_v37 = vld [vmem:[#allocation8 + $0x78] sm:$0xff]  ;;  %v543_v40 = vld [vmem:[#allocation8 + $0x1f0] sm:$0xff]  ;;  %v542_v44 = vld [vmem:[#allocation8 + $0x1e8] sm:$0xff] }
  0x42   :  { %938 = vmatmul.mubr.msk.f32.gmra.mxu0 %vm150_vm0, %v75_v22  ;;  %940 = vmatmul.mubr.msk.f32.gmra.mxu1 %vm150_vm0, %v75_v22  ;;  %v528_v38 = vld [vmem:[#allocation8 + $0x178] sm:$0xff]  ;;  %v495_v41 = vld [vmem:[#allocation8 + $0x70] sm:$0xff]  ;;  %v494_v45 = vld [vmem:[#allocation8 + $0x68] sm:$0xff] }
  0x43   :  { %338 = vmatpush1.msra.mxu0 %v96_v23  ;;  %413 = vmatpush1.msra.mxu1 %v106_v24  ;;  %v527_v42 = vld [vmem:[#allocation8 + $0x170] sm:$0xff]  ;;  %v526_v46 = vld [vmem:[#allocation8 + $0x168] sm:$0xff]  ;;  %v509_v47 = vld [vmem:[#allocation8 + $0xe0] sm:$0xff] }
  0x44   :  { %339 = vmatprep.subr.mxu0 %v89_v25  ;;  %414 = vmatprep.subr.mxu1 %v99_v26  ;;  %v541_v48 = vld [vmem:[#allocation8 + $0x1e0] sm:$0xff]  ;;  %v508_v51 = vld [vmem:[#allocation8 + $0xd8] sm:$0xff]  ;;  %v507_v55 = vld [vmem:[#allocation8 + $0xd0] sm:$0xff] }
  0x45   :  { %340 = vmatpush1.msra.mxu0 %v88_v27  ;;  %415 = vmatpush1.msra.mxu1 %v98_v28  ;;  %v493_v49 = vld [vmem:[#allocation8 + $0x60] sm:$0xff]  ;;  %v540_v52 = vld [vmem:[#allocation8 + $0x1d8] sm:$0xff]  ;;  %v539_v56 = vld [vmem:[#allocation8 + $0x1d0] sm:$0xff] }
  0x46   :  { %341 = vmatprep.subr.mxu0 %v81_v29  ;;  %416 = vmatprep.subr.mxu1 %v91_v30  ;;  %v525_v50 = vld [vmem:[#allocation8 + $0x160] sm:$0xff]  ;;  %v492_v53 = vld [vmem:[#allocation8 + $0x58] sm:$0xff]  ;;  %v491_v57 = vld [vmem:[#allocation8 + $0x50] sm:$0xff] }
  0x47   :  { %342 = vmatpush1.msra.mxu0 %v80_v31  ;;  %375 = vmatprep.mubr.f32.mxu0 %v1256_v0  ;;  %v524_v54 = vld [vmem:[#allocation8 + $0x158] sm:$0xff]  ;;  %v523_v58 = vld [vmem:[#allocation8 + $0x150] sm:$0xff]  ;;  %v506_v59 = vld [vmem:[#allocation8 + $0xc8] sm:$0xff] }
  0x48   :  { %417 = vmatpush1.msra.mxu1 %v90_v32  ;;  %941 = vmatmul.mubr.msk.f32.vlgmr.msra.gmra.mxu0 %vm150_vm0, %v74_v17  ;;  %v538_v60 = vld [vmem:[#allocation8 + $0x1c8] sm:$0xff]  ;;  %v505_v63 = vld [vmem:[#allocation8 + $0xc0] sm:$0xff]  ;;  %v504_v3 = vld [vmem:[#allocation8 + $0xb8] sm:$0xff] }
  0x49   :  { %418 = vmatprep.subr.mxu1 %v83_v33  ;;  %452 = vmatprep.mubr.f32.mxu1 %v1256_v0  ;;  %v490_v61 = vld [vmem:[#allocation8 + $0x48] sm:$0xff]  ;;  %v489_v1 = vld [vmem:[#allocation8 + $0x40] sm:$0xff]  ;;  %v536_v4 = vld [vmem:[#allocation8 + $0x1b8] sm:$0xff] }
  0x4a   :  { %419 = vmatpush1.msra.mxu1 %v82_v34  ;;  %381 = vmatprep.mubr.f32.mxu0 %v1256_v0  ;;  %v522_v62 = vld [vmem:[#allocation8 + $0x148] sm:$0xff]  ;;  %v521_v2 = vld [vmem:[#allocation8 + $0x140] sm:$0xff]  ;;  %v488_v5 = vld [vmem:[#allocation8 + $0x38] sm:$0xff] }
  0x4b   :  { %943 = vmatmul.mubr.msk.f32.vlgmr.msra.gmra.mxu1 %vm150_vm0, %v74_v17  ;;  %946 = vmatprep.subr.mxu0 %v512_v35  ;;  %v520_v6 = vld [vmem:[#allocation8 + $0x138] sm:$0xff]  ;;  %v503_v7 = vld [vmem:[#allocation8 + $0xb0] sm:$0xff]  ;;  %v502_v11 = vld [vmem:[#allocation8 + $0xa8] sm:$0xff] }
  0x4c   :  { %942 = vmatmul.mubr.msk.f32.gmra.mxu0 %vm150_vm0, %v75_v22  ;;  %458 = vmatprep.mubr.f32.mxu1 %v1256_v0  ;;  %v537_v0 = vld [vmem:[#allocation8 + $0x1c0] sm:$0xff]  ;;  %v535_v8 = vld [vmem:[#allocation8 + $0x1b0] sm:$0xff]  ;;  %v534_v12 = vld [vmem:[#allocation8 + $0x1a8] sm:$0xff] }
  0x4d   :  { %984 = vmatprep.subr.mxu1 %v544_v36  ;;  %947 = vmatpush3.msra.mxu0 %v496_v37  ;;  %v487_v9 = vld [vmem:[#allocation8 + $0x30] sm:$0xff]  ;;  %v486_v13 = vld [vmem:[#allocation8 + $0x28] sm:$0xff]  ;;  %v501_v15 = vld [vmem:[#allocation8 + $0xa0] sm:$0xff]  ;;  %v110_v37 = vlaneseq }
  0x4e   :  { %985 = vmatpush3.msra.mxu1 %v528_v38  ;;  %948 = vmatprep.subr.mxu0 %v511_v39  ;;  %v519_v10 = vld [vmem:[#allocation8 + $0x130] sm:$0xff]  ;;  %v518_v14 = vld [vmem:[#allocation8 + $0x128] sm:$0xff]  ;;  %v533_v16 = vld [vmem:[#allocation8 + $0x1a0] sm:$0xff] }
  0x4f   :  { %944 = vmatmul.mubr.msk.f32.gmra.mxu1 %vm150_vm0, %v75_v22  ;;  %986 = vmatprep.subr.mxu1 %v543_v40  ;;  %v485_v17 = vld [vmem:[#allocation8 + $0x20] sm:$0xff]  ;;  %v500_v19 = vld [vmem:[#allocation8 + $0x98] sm:$0xff]  ;;  %v499_v23 = vld [vmem:[#allocation8 + $0x90] sm:$0xff]  ;;  %v1322_v38 = vshrl.u32 %v110_v37, 7 }
  0x50   :  { %949 = vmatpush3.msra.mxu0 %v495_v41  ;;  %987 = vmatpush3.msra.mxu1 %v527_v42  ;;  %v517_v18 = vld [vmem:[#allocation8 + $0x120] sm:$0xff]  ;;  %v532_v20 = vld [vmem:[#allocation8 + $0x198] sm:$0xff]  ;;  %v531_v24 = vld [vmem:[#allocation8 + $0x190] sm:$0xff] }
  0x51   :  { %950 = vmatprep.subr.mxu0 %v510_v43  ;;  %988 = vmatprep.subr.mxu1 %v542_v44  ;;  %v484_v21 = vld [vmem:[#allocation8 + $0x18] sm:$0xff]  ;;  %v483_v25 = vld [vmem:[#allocation8 + $0x10] sm:$0xff]  ;;  %v498_v27 = vld [vmem:[#allocation8 + $0x88] sm:$0xff]  ;;  %v112_v39 = vsub.s32 0, %v1322_v38  ;;  %v120_v40 = vsub.s32 2, %v1322_v38  ;;  %v116_v42 = vsub.s32 1, %v1322_v38 }
  0x52   :  { %951 = vmatpush3.msra.mxu0 %v494_v45  ;;  %989 = vmatpush3.msra.mxu1 %v526_v46  ;;  %v516_v22 = vld [vmem:[#allocation8 + $0x118] sm:$0xff]  ;;  %v515_v26 = vld [vmem:[#allocation8 + $0x110] sm:$0xff]  ;;  %v530_v28 = vld [vmem:[#allocation8 + $0x188] sm:$0xff]  ;;  %v124_v43 = vsub.s32 3, %v1322_v38 }
  0x53   :  { %952 = vmatprep.subr.mxu0 %v509_v47  ;;  %990 = vmatprep.subr.mxu1 %v541_v48  ;;  %v482_v29 = vld [vmem:[#allocation8 + $0x8] sm:$0xff]  ;;  %v497_v31 = vld [vmem:[#allocation8 + $0x80] sm:$0xff]  ;;  %v576_v35 = vld [vmem:[#allocation8 + $0x2f8] sm:$0xff] }
  0x54   :  { %953 = vmatpush3.msra.mxu0 %v493_v49  ;;  %991 = vmatpush3.msra.mxu1 %v525_v50  ;;  %v514_v30 = vld [vmem:[#allocation8 + $0x108] sm:$0xff]  ;;  %v529_v32 = vld [vmem:[#allocation8 + $0x180] sm:$0xff]  ;;  %v608_v36 = vld [vmem:[#allocation8 + $0x3f8] sm:$0xff] }
  0x55   :  { %954 = vmatprep.subr.mxu0 %v508_v51  ;;  %992 = vmatprep.subr.mxu1 %v540_v52  ;;  %v481_v33 = vld [vmem:[#allocation8] sm:$0xff]  ;;  %v1326_v41 = vld [vmem:[#allocation7] sm:$0xff] }
  0x56   :  { %955 = vmatpush3.msra.mxu0 %v492_v53  ;;  %993 = vmatpush3.msra.mxu1 %v524_v54  ;;  %v513_v34 = vld [vmem:[#allocation8 + $0x100] sm:$0xff]  ;;  %v113_v44 = vrot.slane %v1326_v41, %v112_v39  ;;  %v1332_v45 = vrot.slane %v1326_v41, %v120_v40  ;;  %v117_v46 = vrot.slane %v1326_v41, %v116_v42  ;;  %v602_v39 = vld [vmem:[#allocation8 + $0x3c8] sm:$0xff] }
  0x57   :  { %956 = vmatprep.subr.mxu0 %v507_v55  ;;  %994 = vmatprep.subr.mxu1 %v539_v56  ;;  %v125_v47 = vrot.slane %v1326_v41, %v124_v43  ;;  %v554_v40 = vld [vmem:[#allocation8 + $0x248] sm:$0xff] }
  0x58   :  { %957 = vmatpush3.msra.mxu0 %v491_v57  ;;  %995 = vmatpush3.msra.mxu1 %v523_v58  ;;  %v586_v43 = vld [vmem:[#allocation8 + $0x348] sm:$0xff] }
  0x59   :  { %958 = vmatprep.subr.mxu0 %v506_v59  ;;  %996 = vmatprep.subr.mxu1 %v538_v60 }
  0x5a   :  { %959 = vmatpush3.msra.mxu0 %v490_v61  ;;  %997 = vmatpush3.msra.mxu1 %v522_v62  ;;  %v560_v61 = vld [vmem:[#allocation8 + $0x278] sm:$0xff] }
  0x5b   :  { %960 = vmatprep.subr.mxu0 %v505_v63  ;;  %998 = vmatprep.subr.mxu1 %v537_v0  ;;  %v592_v63 = vld [vmem:[#allocation8 + $0x378] sm:$0xff]  ;;  %v575_v0 = vld [vmem:[#allocation8 + $0x2f0] sm:$0xff] }
  0x5c   :  { %961 = vmatpush3.msra.mxu0 %v489_v1  ;;  %999 = vmatpush3.msra.mxu1 %v521_v2  ;;  %v607_v2 = vld [vmem:[#allocation8 + $0x3f0] sm:$0xff] }
  0x5d   :  { %962 = vmatprep.subr.mxu0 %v504_v3  ;;  %1000 = vmatprep.subr.mxu1 %v536_v4  ;;  %v559_v3 = vld [vmem:[#allocation8 + $0x270] sm:$0xff] }
  0x5e   :  { %963 = vmatpush3.msra.mxu0 %v488_v5  ;;  %1001 = vmatpush3.msra.mxu1 %v520_v6  ;;  %v591_v5 = vld [vmem:[#allocation8 + $0x370] sm:$0xff]  ;;  %v574_v6 = vld [vmem:[#allocation8 + $0x2e8] sm:$0xff] }
  0x5f   :  { %964 = vmatprep.subr.mxu0 %v503_v7  ;;  %1002 = vmatprep.subr.mxu1 %v535_v8  ;;  %v606_v8 = vld [vmem:[#allocation8 + $0x3e8] sm:$0xff] }
  0x60   :  { %965 = vmatpush3.msra.mxu0 %v487_v9  ;;  %1003 = vmatpush3.msra.mxu1 %v519_v10  ;;  %v558_v10 = vld [vmem:[#allocation8 + $0x268] sm:$0xff] }
  0x61   :  { %966 = vmatprep.subr.mxu0 %v502_v11  ;;  %1004 = vmatprep.subr.mxu1 %v534_v12  ;;  %v590_v12 = vld [vmem:[#allocation8 + $0x368] sm:$0xff] }
  0x62   :  { %967 = vmatpush3.msra.mxu0 %v486_v13  ;;  %1005 = vmatpush3.msra.mxu1 %v518_v14  ;;  %v573_v13 = vld [vmem:[#allocation8 + $0x2e0] sm:$0xff] }
  0x63   :  { %968 = vmatprep.subr.mxu0 %v501_v15  ;;  %1006 = vmatprep.subr.mxu1 %v533_v16  ;;  %v605_v15 = vld [vmem:[#allocation8 + $0x3e0] sm:$0xff] }
  0x64   :  { %969 = vmatpush3.msra.mxu0 %v485_v17  ;;  %1007 = vmatpush3.msra.mxu1 %v517_v18  ;;  %v557_v16 = vld [vmem:[#allocation8 + $0x260] sm:$0xff]  ;;  %v132_v17 = vsub.s32 5, %v1322_v38 }
  0x65   :  { %970 = vmatprep.subr.mxu0 %v500_v19  ;;  %1008 = vmatprep.subr.mxu1 %v532_v20  ;;  %v589_v19 = vld [vmem:[#allocation8 + $0x360] sm:$0xff]  ;;  %v572_v20 = vld [vmem:[#allocation8 + $0x2d8] sm:$0xff] }
  0x66   :  { %971 = vmatpush3.msra.mxu0 %v484_v21  ;;  %1009 = vmatpush3.msra.mxu1 %v516_v22  ;;  %v128_v21 = vsub.s32 4, %v1322_v38 }
  0x67   :  { %972 = vmatprep.subr.mxu0 %v499_v23  ;;  %1010 = vmatprep.subr.mxu1 %v531_v24  ;;  %v604_v23 = vld [vmem:[#allocation8 + $0x3d8] sm:$0xff] }
  0x68   :  { %973 = vmatpush3.msra.mxu0 %v483_v25  ;;  %1011 = vmatpush3.msra.mxu1 %v515_v26  ;;  %v556_v24 = vld [vmem:[#allocation8 + $0x258] sm:$0xff]  ;;  %v136_v25 = vsub.s32 6, %v1322_v38 }
  0x69   :  { %974 = vmatprep.subr.mxu0 %v498_v27  ;;  %1012 = vmatprep.subr.mxu1 %v530_v28  ;;  %v588_v28 = vld [vmem:[#allocation8 + $0x358] sm:$0xff] }
  0x6a   :  { %975 = vmatpush3.msra.mxu0 %v482_v29  ;;  %1013 = vmatpush3.msra.mxu1 %v514_v30  ;;  %v571_v29 = vld [vmem:[#allocation8 + $0x2d0] sm:$0xff]  ;;  %v140_v30 = vsub.s32 7, %v1322_v38  ;;  %v137_v38 = vrot.slane %v1326_v41, %v136_v25 }
  0x6b   :  { %976 = vmatprep.subr.mxu0 %v497_v31  ;;  %1014 = vmatprep.subr.mxu1 %v529_v32  ;;  %v603_v31 = vld [vmem:[#allocation8 + $0x3d0] sm:$0xff] }
  0x6c   :  { %977 = vmatpush3.msra.mxu0 %v481_v33  ;;  %1015 = vmatpush3.msra.mxu1 %v513_v34  ;;  %v555_v32 = vld [vmem:[#allocation8 + $0x250] sm:$0xff]  ;;  %v133_v33 = vrot.slane %v1326_v41, %v132_v17  ;;  %v1348_v34 = vrot.slane %v1326_v41, %v128_v21  ;;  %v580_v17 = vld [vmem:[#allocation8 + $0x318] sm:$0xff] }
  0x6d   :  { %1022 = vmatprep.subr.mxu0 %v576_v35  ;;  %1060 = vmatprep.subr.mxu1 %v608_v36  ;;  %v587_v35 = vld [vmem:[#allocation8 + $0x350] sm:$0xff]  ;;  %v570_v36 = vld [vmem:[#allocation8 + $0x2c8] sm:$0xff] }
  0x6e   :  { %v579_v21 = vld [vmem:[#allocation8 + $0x310] sm:$0xff] }
  0xfe   :  { %v223_v48 = vpop.f32.mrf.mxu0  ;;  %v300_v49 = vpop.f32.mrf.mxu1 }
  0xff   :  { %v224_v50 = vadd.f32 %v223_v48, %v113_v44  ;;  %v301_v51 = vadd.f32 %v300_v49, %v1332_v45  ;;  %v553_v48 = vld [vmem:[#allocation8 + $0x240] sm:$0xff] }
 0x100   :  { %v225_v52 = vpop.f32.mrf.mxu0  ;;  %v302_v53 = vpop.f32.mrf.mxu1 }
 0x101   :  { %1108 = vtanh.f32 %v224_v50  ;;  %v226_v54 = vadd.f32 %v225_v52, %v117_v46  ;;  %v303_v55 = vadd.f32 %v302_v53, %v125_v47  ;;  %v585_v50 = vld [vmem:[#allocation8 + $0x340] sm:$0xff]  ;;  %v568_v52 = vld [vmem:[#allocation8 + $0x2b8] sm:$0xff] }
 0x102   :  { %1110 = vtanh.f32 %v301_v51  ;;  %v229_v56 = vpop.f32.mrf.mxu0  ;;  %v306_v58 = vpop.f32.mrf.mxu1 }
 0x103   :  { %1112 = vtanh.f32 %v226_v54  ;;  %v230_v14 = vadd.f32 %v229_v56, %v113_v44  ;;  %v307_v27 = vadd.f32 %v306_v58, %v1332_v45  ;;  %v141_v44 = vrot.slane %v1326_v41, %v140_v30  ;;  %v569_v45 = vld [vmem:[#allocation8 + $0x2c0] sm:$0xff]  ;;  %v600_v54 = vld [vmem:[#allocation8 + $0x3b8] sm:$0xff]  ;;  %v567_v58 = vld [vmem:[#allocation8 + $0x2b0] sm:$0xff] }
 0x104   :  { %1114 = vtanh.f32 %v303_v55  ;;  %v231_v1 = vpop.f32.mrf.mxu0  ;;  %v308_v4 = vpop.f32.mrf.mxu1  ;;  %v552_v41 = vld [vmem:[#allocation8 + $0x238] sm:$0xff] }
 0x105   :  { %v232_v9 = vadd.f32 %v231_v1, %v117_v46  ;;  %v309_v18 = vadd.f32 %v308_v4, %v125_v47  ;;  %v601_v47 = vld [vmem:[#allocation8 + $0x3c0] sm:$0xff]  ;;  %v598_v1 = vld [vmem:[#allocation8 + $0x3a8] sm:$0xff] }
 0x106   :  { %v582_v4 = vld [vmem:[#allocation8 + $0x328] sm:$0xff] }
 0x107   :  { %1116 = vtanh.f32 %v232_v9 }
 0x108   :  { %v1337_v7 = vpop.f32.mrf.mxu0  ;;  %1118 = vtanh.f32 %v230_v14  ;;  %v596_v14 = vld [vmem:[#allocation8 + $0x398] sm:$0xff] }
 0x109   :  { %1120 = vtanh.f32 %v309_v18  ;;  %v378_v49 = vadd.f32 %v1337_v7, %v1348_v34  ;;  %v597_v7 = vld [vmem:[#allocation8 + $0x3a0] sm:$0xff]  ;;  %v563_v18 = vld [vmem:[#allocation8 + $0x290] sm:$0xff] }
 0x10a   :  { %v379_v22 = vpop.f32.mrf.mxu0  ;;  %1122 = vtanh.f32 %v307_v27 }
 0x10b   :  { %v1339_v11 = vpop.f32.mrf.mxu1  ;;  %v380_v46 = vadd.f32 %v379_v22, %v133_v33  ;;  %v562_v22 = vld [vmem:[#allocation8 + $0x288] sm:$0xff] }
 0x10c   :  { %v1350_v37 = vpop.f32.mrf.mxu0  ;;  %v455_v53 = vadd.f32 %v1339_v11, %v137_v38 }
 0x10d   :  { %v456_v26 = vpop.f32.mrf.mxu1  ;;  %1124 = vtanh.f32 %v380_v46  ;;  %v384_v9 = vadd.f32 %v1350_v37, %v1348_v34  ;;  %v945_v46 = vld [vmem:[%s1372_s4] ss:$0 sm:$0xff]  ;;  %s1257_s4 = smov [#allocation10]  }
 0x10e   :  { %v1109_v57 = vpop.eup %1108  ;;  %v385_v51 = vpop.f32.mrf.mxu0  ;;  %v457_v56 = vadd.f32 %v456_v26, %v141_v44  ;;  %1126 = vtanh.f32 %v378_v49  ;;  %v578_v26 = vld [vmem:[#allocation8 + $0x308] sm:$0xff]  ;;  %s923_s15 = sshll.u32 %s1257_s4, 4  ;;  %s924_s15 = int_to_ptr.vmem [resolvable:$true] %s923_s15 }
 0x10f   :  { %v1111_v59 = vpop.eup %1110  ;;  %v460_v42 = vpop.f32.mrf.mxu1  ;;  %1128 = vtanh.f32 %v455_v53  ;;  %s1220_s16 = scalar_lea.vmem %s924_s15, 256  ;;  %p1225_p7 = scmp.lt.s32.totalorder %s924_s15, %s924_s15 }
 0x110   :  { %v1113_v60 = vpop.eup %1112  ;;  %1130 = vtanh.f32 %v457_v56  ;;  %p1221_p6 = scmp.ne.s32.totalorder %s924_s15, %s1220_s16  ;;  %p1226_p8 = scmp.lt.s32.totalorder %s1220_s16, %s1220_s16 }
 0x111   :  { %v1115_v62 = vpop.eup %1114  ;;  %680 = vmatprep.mubr.f32.mxu0 %v1113_v60  ;;  %v462_v55 = vpop.f32.mrf.mxu1  ;;  %v599_v60 = vld [vmem:[#allocation8 + $0x3b0] sm:$0xff] }
 0x112   :  { %755 = vmatprep.mubr.f32.mxu1 %v1115_v62  ;;  %681 = vmatmul.mubr.f32.vlgmr.msra.gmra.mxu0 %v1109_v57  ;;  %v584_v57 = vld [vmem:[#allocation8 + $0x338] sm:$0xff]  ;;  %v463_v62 = vadd.f32 %v462_v55, %v141_v44  ;;  %p1227_p9 = por %p1226_p8, %p1225_p7 }
 0x113   :  { %756 = vmatmul.mubr.f32.vlgmr.msra.gmra.mxu1 %v1111_v59  ;;  %1023 = vmatpush3.msra.mxu0 %v560_v61  ;;  %v386_v59 = vadd.f32 %v385_v51, %v133_v33  ;;  %v551_v61 = vld [vmem:[#allocation8 + $0x230] sm:$0xff] }
 0x114   :  { %1061 = vmatpush3.msra.mxu1 %v592_v63  ;;  %1024 = vmatprep.subr.mxu0 %v575_v0  ;;  %v583_v63 = vld [vmem:[#allocation8 + $0x330] sm:$0xff]  ;;  %v566_v0 = vld [vmem:[#allocation8 + $0x2a8] sm:$0xff]  ;;  %p1228_p10 = pnand %p1227_p9, %p1221_p6 }
 0x115   :  { %1062 = vmatprep.subr.mxu1 %v607_v2  ;;  %1025 = vmatpush3.msra.mxu0 %v559_v3  ;;  %v550_v2 = vld [vmem:[#allocation8 + $0x228] sm:$0xff]  ;;  %v1117_v3 = vpop.eup %1116  ;;  %1132 = vtanh.f32 %v386_v59 }
 0x116   :  { %1063 = vmatpush3.msra.mxu1 %v591_v5  ;;  %1026 = vmatprep.subr.mxu0 %v574_v6  ;;  %v461_v5 = vadd.f32 %v460_v42, %v137_v38  ;;  %v565_v6 = vld [vmem:[#allocation8 + $0x2a0] sm:$0xff]  ;;  %1134 = vtanh.f32 %v463_v62 }
 0x117   :  { %1064 = vmatprep.subr.mxu1 %v606_v8  ;;  %1027 = vmatpush3.msra.mxu0 %v558_v10  ;;  %v1119_v8 = vpop.eup %1118  ;;  %v581_v10 = vld [vmem:[#allocation8 + $0x320] sm:$0xff] }
 0x118   :  { %1065 = vmatpush3.msra.mxu1 %v590_v12  ;;  %1028 = vmatprep.subr.mxu0 %v573_v13  ;;  %v1121_v11 = vpop.eup %1120  ;;  %v549_v12 = vld [vmem:[#allocation8 + $0x220] sm:$0xff]  ;;  %v564_v13 = vld [vmem:[#allocation8 + $0x298] sm:$0xff]  ;;  %1136 = vtanh.f32 %v461_v5 }
 0x119   :  { %1066 = vmatprep.subr.mxu1 %v605_v15  ;;  %1029 = vmatpush3.msra.mxu0 %v557_v16  ;;  %v1123_v15 = vpop.eup %1122  ;;  %v548_v16 = vld [vmem:[#allocation8 + $0x218] sm:$0xff]  ;;  %1138 = vtanh.f32 %v384_v9 }
 0x11a   :  { %1067 = vmatpush3.msra.mxu1 %v589_v19  ;;  %1030 = vmatprep.subr.mxu0 %v572_v20  ;;  %v595_v19 = vld [vmem:[#allocation8 + $0x390] sm:$0xff]  ;;  %v1125_v25 = vpop.eup %1124 }
 0x11b   :  { %1068 = vmatprep.subr.mxu1 %v604_v23  ;;  %1031 = vmatpush3.msra.mxu0 %v556_v24  ;;  %v547_v20 = vld [vmem:[#allocation8 + $0x210] sm:$0xff]  ;;  %v594_v23 = vld [vmem:[#allocation8 + $0x388] sm:$0xff]  ;;  %v1127_v27 = vpop.eup %1126 }
 0x11c   :  { %1069 = vmatpush3.msra.mxu1 %v588_v28  ;;  %1032 = vmatprep.subr.mxu0 %v571_v29  ;;  %v546_v24 = vld [vmem:[#allocation8 + $0x208] sm:$0xff]  ;;  %v561_v28 = vld [vmem:[#allocation8 + $0x280] sm:$0xff]  ;;  %v1129_v30 = vpop.eup %1128 }
 0x11d   :  { %1070 = vmatprep.subr.mxu1 %v603_v31  ;;  %1033 = vmatpush3.msra.mxu0 %v555_v32  ;;  %v593_v29 = vld [vmem:[#allocation8 + $0x380] sm:$0xff]  ;;  %v1131_v33 = vpop.eup %1130 }
 0x11e   :  { %1071 = vmatpush3.msra.mxu1 %v587_v35  ;;  %1034 = vmatprep.subr.mxu0 %v570_v36  ;;  %v545_v31 = vld [vmem:[#allocation8 + $0x200] sm:$0xff] }
 0x11f   :  { %1072 = vmatprep.subr.mxu1 %v602_v39  ;;  %1035 = vmatpush3.msra.mxu0 %v554_v40  ;;  %v577_v32 = vld [vmem:[#allocation8 + $0x300] sm:$0xff] }
 0x120   :  { %1073 = vmatpush3.msra.mxu1 %v586_v43  ;;  %1036 = vmatprep.subr.mxu0 %v569_v45 }
 0x121   :  { %1074 = vmatprep.subr.mxu1 %v601_v47  ;;  %1037 = vmatpush3.msra.mxu0 %v553_v48 }
 0x122   :  { %1075 = vmatpush3.msra.mxu1 %v585_v50  ;;  %1038 = vmatprep.subr.mxu0 %v568_v52  ;;  %v1133_v34 = vpop.eup %1132 }
 0x123   :  { %1076 = vmatprep.subr.mxu1 %v600_v54  ;;  %1039 = vmatpush3.msra.mxu0 %v552_v41  ;;  %v1135_v35 = vpop.eup %1134 }
 0x124   :  { %1077 = vmatpush3.msra.mxu1 %v584_v57  ;;  %1040 = vmatprep.subr.mxu0 %v567_v58 }
 0x125   :  { %1078 = vmatprep.subr.mxu1 %v599_v60  ;;  %1041 = vmatpush3.msra.mxu0 %v551_v61  ;;  %v1137_v36 = vpop.eup %1136 }
 0x126   :  { %1079 = vmatpush3.msra.mxu1 %v583_v63  ;;  %1042 = vmatprep.subr.mxu0 %v566_v0  ;;  %v1139_v37 = vpop.eup %1138 }
 0x127   :  { %1080 = vmatprep.subr.mxu1 %v598_v1  ;;  %1043 = vmatpush3.msra.mxu0 %v550_v2 }
 0x128   :  { %1081 = vmatpush3.msra.mxu1 %v582_v4  ;;  %685 = vmatprep.mubr.f32.mxu0 %v1117_v3 }
 0x129   :  { %1044 = vmatprep.subr.mxu0 %v565_v6  ;;  %1082 = vmatprep.subr.mxu1 %v597_v7 }
 0x12a   :  { %686 = vmatmul.mubr.f32.gmra.mxu0 %v1119_v8  ;;  %1083 = vmatpush3.msra.mxu1 %v581_v10 }
 0x12b   :  { %1045 = vmatpush3.msra.mxu0 %v549_v12  ;;  %760 = vmatprep.mubr.f32.mxu1 %v1121_v11 }
 0x12c   :  { %1046 = vmatprep.subr.mxu0 %v564_v13  ;;  %1084 = vmatprep.subr.mxu1 %v596_v14 }
 0x12d   :  { %761 = vmatmul.mubr.f32.gmra.mxu1 %v1123_v15  ;;  %1047 = vmatpush3.msra.mxu0 %v548_v16 }
 0x12e   :  { %1085 = vmatpush3.msra.mxu1 %v580_v17  ;;  %1048 = vmatprep.subr.mxu0 %v563_v18 }
 0x12f   :  { %1086 = vmatprep.subr.mxu1 %v595_v19  ;;  %1049 = vmatpush3.msra.mxu0 %v547_v20 }
 0x130   :  { %1087 = vmatpush3.msra.mxu1 %v579_v21  ;;  %1050 = vmatprep.subr.mxu0 %v562_v22 }
 0x131   :  { %1088 = vmatprep.subr.mxu1 %v594_v23  ;;  %1051 = vmatpush3.msra.mxu0 %v546_v24 }
 0x132   :  { %830 = vmatprep.mubr.f32.mxu0 %v1125_v25  ;;  %1089 = vmatpush3.msra.mxu1 %v578_v26 }
 0x133   :  { %1052 = vmatprep.subr.mxu0 %v561_v28  ;;  %1090 = vmatprep.subr.mxu1 %v593_v29 }
 0x134   :  { %1053 = vmatpush3.msra.mxu0 %v545_v31  ;;  %1091 = vmatpush3.msra.mxu1 %v577_v32 }
 0x135   :  { %905 = vmatprep.mubr.f32.mxu1 %v1131_v33  ;;  %831 = vmatmul.mubr.f32.vlgmr.msra.gmra.mxu0 %v1127_v27 }
 0x136   :  { %906 = vmatmul.mubr.f32.vlgmr.msra.gmra.mxu1 %v1129_v30  ;;  %835 = vmatprep.mubr.f32.mxu0 %v1133_v34 }
 0x137   :  { %910 = vmatprep.mubr.f32.mxu1 %v1135_v35 }
 0x139   :  { %836 = vmatmul.mubr.f32.gmra.mxu0 %v1139_v37 }
 0x13a   :  { %911 = vmatmul.mubr.f32.gmra.mxu1 %v1137_v36 }
 0x1d2   :  { %v978_v38 = vpop.f32.mrf.mxu0 }
 0x1d3   :  { %v1016_v39 = vpop.f32.mrf.mxu1 }
 0x1d4   :  { %v979_v40 = vpop.f32.mrf.mxu0 }
 0x1d5   :  { %v1017_v43 = vpop.f32.mrf.mxu1  ;;  %v980_v44 = vadd.f32 %v979_v40, %v978_v38 }
 0x1d6   :  { %v1018_v52 = vadd.f32 %v1017_v43, %v1016_v39 }
 0x1d7   :  { %v683_v48 = vadd.f32 %v980_v44, %v945_v46 }
 0x1d9   :  { %v758_v41 = vadd.f32 %v1018_v52, %v683_v48 }
 0x1ea   :  { %v981_v42 = vpop.f32.mrf.mxu0 }
 0x1ec   :  { %v982_v47 = vpop.f32.mrf.mxu0 }
 0x1ed   :  { %v1019_v45 = vpop.f32.mrf.mxu1  ;;  %v983_v49 = vadd.f32 %v982_v47, %v981_v42 }
 0x1ef   :  { %v1020_v50 = vpop.f32.mrf.mxu1  ;;  %v688_v55 = vadd.f32 %v983_v49, %v945_v46 }
 0x1f0   :  { %v1021_v56 = vadd.f32 %v1020_v50, %v1019_v45 }
 0x1f2   :  { %v763_v0 = vadd.f32 %v1021_v56, %v688_v55 }
 0x1f5   :  { %v1054_v51 = vpop.f32.mrf.mxu0 }
 0x1f6   :  { %v1092_v53 = vpop.f32.mrf.mxu1 }
 0x1f7   :  { %v1055_v54 = vpop.f32.mrf.mxu0 }
 0x1f8   :  { %v1056_v57 = vadd.f32 %v1055_v54, %v1054_v51  ;;  %v1093_v58 = vpop.f32.mrf.mxu1 }
 0x1f9   :  { %v1057_v59 = vpop.f32.mrf.mxu0  ;;  %v1094_v61 = vadd.f32 %v1093_v58, %v1092_v53 }
 0x1fa   :  { %v833_v60 = vadd.f32 %v1056_v57, %v758_v41  ;;  %v1095_v62 = vpop.f32.mrf.mxu1 }
 0x1fb   :  { %v1058_v63 = vpop.f32.mrf.mxu0 }
 0x1fc   :  { %v908_v1 = vadd.f32 %v1094_v61, %v833_v60  ;;  %v1059_v2 = vadd.f32 %v1058_v63, %v1057_v59  ;;  %v1096_v3 = vpop.f32.mrf.mxu1 }
 0x1fd   :  { %v1097_v5 = vadd.f32 %v1096_v3, %v1095_v62 }
 0x1fe   :  { %916 = vst [vmem:[#allocation10] sm:$0xff] %v908_v1  ;;  %v838_v4 = vadd.f32 %v1059_v2, %v763_v0 }
 0x200   :  { %v913_v6 = vadd.f32 %v1097_v5, %v838_v4 }
 0x202   :  { %917 = vst [vmem:[#allocation10 + $0x8] sm:$0xff] %v913_v6 }
 0x203   :  { %1231 = shalt.err (!%p1228_p10)
}
 0x204   :  { %929 = dma.vmem_to_hbm [thread:$0]  %s924_s15, 256, %s1373_s5, [#allocation4], %s1252_s28, %s1252_s28, %s1253_s29  }
 0x205   :  { %1246 = dma.done.wait [#allocation4], 256  }
 0x206   :  { %1247 = vsyncadd [#allocation4], 4294967040 }
 0x207   :  { %933 = vsyncpa [#allocation3], 1 }
 0x208   :  { %934 = vsyncpa [#allocation6], 1 }
 0x209   :  { %935 = vsyncpa [#allocation9], 1 }
 0x20a   :  { %936 = vsyncpa [#allocation4], 1 }

</bundles_post_ra>
